<compile_context>
chip_gen: v7x
topology: tpu7x:2x2x1
jax: 0.10.0
libtpu: 0.0.40
codegen_flags: <defaults>
</compile_context>

<pallas_src>
import jax
import jax.numpy as jnp
import numpy as np
from jax.experimental import pallas as pl
from jax.experimental.pallas import tpu as pltpu

B = 2
C_IN = 16
L = 840                    # forced by Linear(32*210, 2): 840 -> /2 -> 420 -> /2 -> 210
C1, C2 = 16, 32
L1, L2, L3 = L, L // 2, L // 4
N_OUT = 2
KSIZE = 3

S1W = 896                  # conv1 scratch width: multiple of 128, >= 2 + L1 + 3
S2W = 896                  # conv2 scratch width: multiple of 128, >= L1 + 2

FLOPS = B * (2 * C1 * (KSIZE * C_IN) * L1
             + 2 * C2 * (KSIZE * C1) * L1
             + 2 * N_OUT * C2 * L1)
BYTES_ACCESSED = (B * C_IN * (L + 2) * 2                 # x (bf16)
                  + C1 * KSIZE * C_IN * 2 + C2 * KSIZE * C1 * 2
                  + (C1 + C2 + N_OUT) * 4
                  + N_OUT * C2 * L1 * 2                  # dilated linear weight (bf16)
                  + B * N_OUT * 4)


def _batch_per_step():
    """Batch items per grid step.

    Single-TC chips (v5e/v6e): one grid step for the whole batch (each extra
    step costs ~0.35us of fixed overhead -- a big fraction of this tiny
    kernel).  Multi-TC chips (v7x / megacore): one item per step so the
    "parallel" grid axis shards the batch across TensorCores.
    """
    try:
        kind = jax.devices()[0].device_kind.lower()
    except Exception:
        return 1
    single_tc = any(t in kind for t in ("v5e", "v5 lite", "v5lite",
                                        "v6e", "v6 lite", "v6lite"))
    return B if single_tc else 1


def cnn_kernel(x_ref, w1_ref, b1_ref, w2_ref, b2_ref, wl_ref, bl_ref,
               out_ref, s1_ref, s2_ref):
    # x_ref  : (NB, 16, 842)  bf16  zero-padded input (Conv1d padding=1 applied in glue)
    # w1_ref : (16, 48)       bf16  conv1 weight, taps fused into K  [o, k*C_IN + c]
    # b1_ref : (16, 1)        f32
    # w2_ref : (32, 48)       bf16  conv2 weight, taps fused into K  [o, k*C1 + c]
    # b2_ref : (32, 1)        f32
    # wl_ref : (2, 32, 840)   bf16  linear weight dilated x4 along length (zeros off 4l lanes)
    # bl_ref : (1, 2)         f32
    # out_ref: (NB, 1, 2)     f32
    # s1_ref : (NB, 16, 896)  f32   conv1+relu at lane offset 2, zero borders
    # s2_ref : (NB, 32, 896)  f32   conv2+relu in dilated layout, zero tail
    nb = x_ref.shape[0]
    for j in range(nb):                                   # static, unrolled
        s1 = s1_ref.at[j]                                 # (16, 896) view
        s2 = s2_ref.at[j]                                 # (32, 896) view
        xb = x_ref[j]                                     # (16, 842)  bf16

        # ---- conv1 (k=3, pad=1): taps stacked along K -> one (16,48)x(48,840) bf16 dot
        x1 = jnp.concatenate([xb[:, k:k + L1] for k in range(KSIZE)], axis=0)
        y1 = jnp.dot(w1_ref[...], x1, preferred_element_type=jnp.float32)   # (16,840) f32
        s1[:, 0:2] = jnp.zeros((C1, 2), jnp.float32)
        s1[:, 2:2 + L1] = jnp.maximum(y1 + b1_ref[...], 0.0)
        s1[:, 2 + L1:] = jnp.zeros((C1, S1W - 2 - L1), jnp.float32)

        # ---- MaxPool1d(2) #1 fused into conv2 taps (dilated lane layout):
        #   pd[:, 2i] == pool1_padded[:, i-1]  (zero pads at i=0 and i=421)
        pd = jnp.maximum(s1[:, 0:L1 + 4],
                         s1[:, 1:L1 + 5]).astype(jnp.bfloat16)           # (16, 844)
        x2 = jnp.concatenate([pd[:, 2 * k:2 * k + L1] for k in range(KSIZE)],
                             axis=0)                                      # (48, 840)

        # ---- conv2 (k=3, pad=1) on the dilated layout: valid at even lanes
        y2 = jnp.dot(w2_ref[...], x2, preferred_element_type=jnp.float32)  # (32,840) f32
        s2[:, 0:L1] = jnp.maximum(y2 + b2_ref[...], 0.0)
        s2[:, L1:] = jnp.zeros((C2, S2W - L1), jnp.float32)

        # ---- MaxPool1d(2) #2, dilated: h2d[:, 4l] == pool2[:, l]
        h2d = jnp.maximum(s2[:, 0:L1], s2[:, 2:L1 + 2])                   # (32,840) f32

        # ---- Linear(32*210 -> 2): wl pre-dilated so junk lanes multiply by 0.
        # Per-output reduce keeps the live f32 temp at (32,840) instead of (2,32,840).
        parts = [jnp.sum(wl_ref[n] * h2d, axis=(0, 1), keepdims=True)
                 for n in range(N_OUT)]                                   # 2 x (1,1)
        logits = jnp.concatenate(parts, axis=1)[0, :] + bl_ref[0, :]      # (2,)
        out_ref[j, 0, :] = logits


def init_params(key):
    k1, k2, k3, k4, k5, k6 = jax.random.split(key, 6)
    w1 = jax.random.normal(k1, (C1, C_IN, KSIZE), jnp.float32) * 0.1   # (out, in, k)
    b1 = jax.random.normal(k2, (C1,), jnp.float32) * 0.1
    w2 = jax.random.normal(k3, (C2, C1, KSIZE), jnp.float32) * 0.1
    b2 = jax.random.normal(k4, (C2,), jnp.float32) * 0.1
    wl = jax.random.normal(k5, (N_OUT, C2 * L3), jnp.float32) * 0.01   # (out, in)
    bl = jax.random.normal(k6, (N_OUT,), jnp.float32) * 0.01
    return w1, b1, w2, b2, wl, bl


def prepare_params(params):
    """One-time re-layout of the PyTorch-style params into kernel layout.

    Hoisted out of the per-call path (in particular the (2,32,840) dilation
    scatter of the linear weight) so the jitted forward only touches x.
    """
    w1, b1, w2, b2, wl, bl = params
    w1f = jnp.transpose(w1, (0, 2, 1)).reshape(C1, KSIZE * C_IN).astype(jnp.bfloat16)
    w2f = jnp.transpose(w2, (0, 2, 1)).reshape(C2, KSIZE * C1).astype(jnp.bfloat16)
    b1c = b1.reshape(C1, 1).astype(jnp.float32)
    b2c = b2.reshape(C2, 1).astype(jnp.float32)
    # linear weight reshaped to (out, c, l) (matches torch .view(B,-1)) and
    # dilated x4 along l to line up with the dilated pool2 lane layout; bf16
    # halves the largest HBM transfer of the kernel.
    wlr = wl.reshape(N_OUT, C2, L3)
    wl4 = (jnp.zeros((N_OUT, C2, L1), jnp.float32)
           .at[:, :, ::4].set(wlr).astype(jnp.bfloat16))
    blr = bl.reshape(1, N_OUT).astype(jnp.float32)
    return w1f, b1c, w2f, b2c, wl4, blr


def make_cnn_forward(nb):
    grid_b = B // nb

    def cnn_forward(x, kparams):
        w1f, b1c, w2f, b2c, wl4, blr = kparams
        # Only input-dependent glue stays in the per-call path.
        xpad = jnp.pad(x, ((0, 0), (0, 0), (1, 1))).astype(jnp.bfloat16)   # (B,16,842)
        out = pl.pallas_call(
            cnn_kernel,
            out_shape=jax.ShapeDtypeStruct((B, 1, N_OUT), jnp.float32),
            grid=(grid_b,),
            in_specs=[
                pl.BlockSpec((nb, C_IN, L + 2), lambda b: (b, 0, 0)),
                pl.BlockSpec((C1, KSIZE * C_IN), lambda b: (0, 0)),
                pl.BlockSpec((C1, 1), lambda b: (0, 0)),
                pl.BlockSpec((C2, KSIZE * C1), lambda b: (0, 0)),
                pl.BlockSpec((C2, 1), lambda b: (0, 0)),
                pl.BlockSpec((N_OUT, C2, L1), lambda b: (0, 0, 0)),
                pl.BlockSpec((1, N_OUT), lambda b: (0, 0)),
            ],
            out_specs=pl.BlockSpec((nb, 1, N_OUT), lambda b: (b, 0, 0)),
            scratch_shapes=[
                pltpu.VMEM((nb, C1, S1W), jnp.float32),
                pltpu.VMEM((nb, C2, S2W), jnp.float32),
            ],
            compiler_params=pltpu.CompilerParams(
                dimension_semantics=("parallel",)),
            cost_estimate=pl.CostEstimate(flops=FLOPS, transcendentals=0,
                                          bytes_accessed=BYTES_ACCESSED),
        )(xpad, w1f, b1c, w2f, b2c, wl4, blr)
        return out.reshape(B, N_OUT)

    return jax.jit(cnn_forward)


def ref_forward(x, params):
    """Pure-JAX f32 reference mirroring the PyTorch forward."""
    w1, b1, w2, b2, wl, bl = params

    def conv1d(h, w, bias):
        l = h.shape[-1]
        hp = jnp.pad(h, ((0, 0), (0, 0), (1, 1)))
        out = sum(jnp.einsum('oc,bcl->bol', w[:, :, k], hp[:, :, k:k + l])
                  for k in range(KSIZE))
        return out + bias[None, :, None]

    h = jnp.maximum(conv1d(x, w1, b1), 0.0)
    h = jnp.max(h.reshape(B, C1, L2, 2), axis=-1)
    h = jnp.maximum(conv1d(h, w2, b2), 0.0)
    h = jnp.max(h.reshape(B, C2, L3, 2), axis=-1)
    return h.reshape(B, -1) @ wl.T + bl


if __name__ == "__main__":
    key = jax.random.PRNGKey(0)
    kx, kp = jax.random.split(key)
    x = jax.random.normal(kx, (B, C_IN, L), jnp.float32)
    params = init_params(kp)

    kparams = prepare_params(params)              # one-time weight re-layout
    cnn_forward = make_cnn_forward(_batch_per_step())

    out = jax.block_until_ready(cnn_forward(x, kparams))

    ref = ref_forward(x, params)
    np.testing.assert_allclose(np.asarray(out), np.asarray(ref), rtol=2e-2, atol=2e-2)
    print("KERNEL_OK")
</pallas_src>

<mosaic_0001>
module attributes {stable_mosaic.version = 11 : i64} {
  func.func @cnn_kernel(%arg0: i32, %arg1: memref<1x16x842xbf16, #tpu.memory_space<vmem>>, %arg2: memref<16x48xbf16, #tpu.memory_space<vmem>>, %arg3: memref<16x1xf32, #tpu.memory_space<vmem>>, %arg4: memref<32x48xbf16, #tpu.memory_space<vmem>>, %arg5: memref<32x1xf32, #tpu.memory_space<vmem>>, %arg6: memref<2x32x840xbf16, #tpu.memory_space<vmem>>, %arg7: memref<1x2xf32, #tpu.memory_space<vmem>>, %arg8: memref<1x1x2xf32, #tpu.memory_space<vmem>>, %arg9: memref<1x16x896xf32, #tpu.memory_space<vmem>>, %arg10: memref<1x32x896xf32, #tpu.memory_space<vmem>>) attributes {dimension_semantics = [#tpu.dimension_semantics<parallel>], iteration_bounds = array<i64: 2>, scalar_prefetch = 0 : i64, scratch_operands = 2 : i64, tpu.core_type = #tpu.core_type<tc>, window_params = [{transform_indices = @transform_0, window_bounds = array<i64: 1, 16, 842>}, {pipeline_mode = #tpu.pipeline_mode<synchronous>, transform_indices = @transform_1, window_bounds = array<i64: 16, 48>}, {pipeline_mode = #tpu.pipeline_mode<synchronous>, transform_indices = @transform_2, window_bounds = array<i64: 16, 1>}, {pipeline_mode = #tpu.pipeline_mode<synchronous>, transform_indices = @transform_3, window_bounds = array<i64: 32, 48>}, {pipeline_mode = #tpu.pipeline_mode<synchronous>, transform_indices = @transform_4, window_bounds = array<i64: 32, 1>}, {pipeline_mode = #tpu.pipeline_mode<synchronous>, transform_indices = @transform_5, window_bounds = array<i64: 2, 32, 840>}, {pipeline_mode = #tpu.pipeline_mode<synchronous>, transform_indices = @transform_6, window_bounds = array<i64: 1, 2>}, {transform_indices = @transform_7, window_bounds = array<i64: 1, 1, 2>}]} {
    %c0 = arith.constant 0 : index
    %c0_0 = arith.constant 0 : index
    %c0_1 = arith.constant 0 : index
    %0 = vector.load %arg1[%c0, %c0_0, %c0_1] : memref<1x16x842xbf16, #tpu.memory_space<vmem>>, vector<1x16x842xbf16>
    %1 = vector.shape_cast %0 : vector<1x16x842xbf16> to vector<16x842xbf16>
    %2 = vector.extract_strided_slice %1 {offsets = [0, 0], sizes = [16, 840], strides = [1, 1]} : vector<16x842xbf16> to vector<16x840xbf16>
    %3 = vector.extract_strided_slice %1 {offsets = [0, 1], sizes = [16, 840], strides = [1, 1]} : vector<16x842xbf16> to vector<16x840xbf16>
    %4 = vector.extract_strided_slice %1 {offsets = [0, 2], sizes = [16, 840], strides = [1, 1]} : vector<16x842xbf16> to vector<16x840xbf16>
    %5 = tpu.concatenate %2, %3, %4 in 0 : vector<16x840xbf16>, vector<16x840xbf16>, vector<16x840xbf16> -> vector<48x840xbf16>
    %c0_2 = arith.constant 0 : index
    %c0_3 = arith.constant 0 : index
    %6 = vector.load %arg2[%c0_2, %c0_3] : memref<16x48xbf16, #tpu.memory_space<vmem>>, vector<16x48xbf16>
    %cst = arith.constant dense<0.000000e+00> : vector<16x840xf32>
    %7 = tpu.matmul %6, %5, %cst {dimension_numbers = #tpu.dot_dimension_numbers<[1], [0], [0], [1], [0, 0, 1, 1], [], []>} : vector<16x48xbf16>, vector<48x840xbf16>, vector<16x840xf32> -> vector<16x840xf32>
    %cst_4 = arith.constant 0.000000e+00 : f32
    %8 = vector.broadcast %cst_4 : f32 to vector<16x2xf32>
    %c0_i32 = arith.constant 0 : i32
    %c0_i32_5 = arith.constant 0 : i32
    %c0_i32_6 = arith.constant 0 : i32
    %9 = tpu.memref_slice %arg9[%c0_i32, %c0_i32_5, %c0_i32_6] : memref<1x16x896xf32, #tpu.memory_space<vmem>> -> memref<1x16x896xf32, #tpu.memory_space<vmem>>
    %10 = tpu.memref_squeeze %9 : memref<1x16x896xf32, #tpu.memory_space<vmem>> -> memref<16x896xf32, #tpu.memory_space<vmem>>
    %c0_7 = arith.constant 0 : index
    %c0_8 = arith.constant 0 : index
    %11 = vector.load %10[%c0_7, %c0_8] : memref<16x896xf32, #tpu.memory_space<vmem>>, vector<16x2xf32>
    tpu.vector_store %10[%c0_7, %c0_8], %8 {strides = array<i32>} : memref<16x896xf32, #tpu.memory_space<vmem>>, vector<16x2xf32>,
    %c0_9 = arith.constant 0 : index
    %c0_10 = arith.constant 0 : index
    %12 = vector.load %arg3[%c0_9, %c0_10] : memref<16x1xf32, #tpu.memory_space<vmem>>, vector<16x1xf32>
    %13 = vector.broadcast %12 : vector<16x1xf32> to vector<16x840xf32>
    %14 = arith.addf %7, %13 : vector<16x840xf32>
    %cst_11 = arith.constant 0.000000e+00 : f32
    %15 = vector.broadcast %cst_11 : f32 to vector<16x840xf32>
    %16 = arith.maximumf %14, %15 : vector<16x840xf32>
    %c0_i32_12 = arith.constant 0 : i32
    %c0_i32_13 = arith.constant 0 : i32
    %c0_i32_14 = arith.constant 0 : i32
    %17 = tpu.memref_slice %arg9[%c0_i32_12, %c0_i32_13, %c0_i32_14] : memref<1x16x896xf32, #tpu.memory_space<vmem>> -> memref<1x16x896xf32, #tpu.memory_space<vmem>>
    %18 = tpu.memref_squeeze %17 : memref<1x16x896xf32, #tpu.memory_space<vmem>> -> memref<16x896xf32, #tpu.memory_space<vmem>>
    %c0_15 = arith.constant 0 : index
    %c2 = arith.constant 2 : index
    %19 = vector.load %18[%c0_15, %c2] : memref<16x896xf32, #tpu.memory_space<vmem>>, vector<16x840xf32>
    tpu.vector_store %18[%c0_15, %c2], %16 {strides = array<i32>} : memref<16x896xf32, #tpu.memory_space<vmem>>, vector<16x840xf32>,
    %cst_16 = arith.constant 0.000000e+00 : f32
    %20 = vector.broadcast %cst_16 : f32 to vector<16x54xf32>
    %c0_i32_17 = arith.constant 0 : i32
    %c0_i32_18 = arith.constant 0 : i32
    %c0_i32_19 = arith.constant 0 : i32
    %21 = tpu.memref_slice %arg9[%c0_i32_17, %c0_i32_18, %c0_i32_19] : memref<1x16x896xf32, #tpu.memory_space<vmem>> -> memref<1x16x896xf32, #tpu.memory_space<vmem>>
    %22 = tpu.memref_squeeze %21 : memref<1x16x896xf32, #tpu.memory_space<vmem>> -> memref<16x896xf32, #tpu.memory_space<vmem>>
    %c0_20 = arith.constant 0 : index
    %c842 = arith.constant 842 : index
    %23 = vector.load %22[%c0_20, %c842] : memref<16x896xf32, #tpu.memory_space<vmem>>, vector<16x54xf32>
    tpu.vector_store %22[%c0_20, %c842], %20 {strides = array<i32>} : memref<16x896xf32, #tpu.memory_space<vmem>>, vector<16x54xf32>,
    %c0_i32_21 = arith.constant 0 : i32
    %c0_i32_22 = arith.constant 0 : i32
    %c0_i32_23 = arith.constant 0 : i32
    %24 = tpu.memref_slice %arg9[%c0_i32_21, %c0_i32_22, %c0_i32_23] : memref<1x16x896xf32, #tpu.memory_space<vmem>> -> memref<1x16x896xf32, #tpu.memory_space<vmem>>
    %25 = tpu.memref_squeeze %24 : memref<1x16x896xf32, #tpu.memory_space<vmem>> -> memref<16x896xf32, #tpu.memory_space<vmem>>
    %c0_24 = arith.constant 0 : index
    %c0_25 = arith.constant 0 : index
    %26 = vector.load %25[%c0_24, %c0_25] : memref<16x896xf32, #tpu.memory_space<vmem>>, vector<16x844xf32>
    %c0_i32_26 = arith.constant 0 : i32
    %c0_i32_27 = arith.constant 0 : i32
    %c0_i32_28 = arith.constant 0 : i32
    %27 = tpu.memref_slice %arg9[%c0_i32_26, %c0_i32_27, %c0_i32_28] : memref<1x16x896xf32, #tpu.memory_space<vmem>> -> memref<1x16x896xf32, #tpu.memory_space<vmem>>
    %28 = tpu.memref_squeeze %27 : memref<1x16x896xf32, #tpu.memory_space<vmem>> -> memref<16x896xf32, #tpu.memory_space<vmem>>
    %c0_29 = arith.constant 0 : index
    %c1 = arith.constant 1 : index
    %29 = vector.load %28[%c0_29, %c1] : memref<16x896xf32, #tpu.memory_space<vmem>>, vector<16x844xf32>
    %30 = arith.maximumf %26, %29 : vector<16x844xf32>
    %31 = arith.truncf %30 : vector<16x844xf32> to vector<16x844xbf16>
    %32 = vector.extract_strided_slice %31 {offsets = [0, 0], sizes = [16, 840], strides = [1, 1]} : vector<16x844xbf16> to vector<16x840xbf16>
    %33 = vector.extract_strided_slice %31 {offsets = [0, 2], sizes = [16, 840], strides = [1, 1]} : vector<16x844xbf16> to vector<16x840xbf16>
    %34 = vector.extract_strided_slice %31 {offsets = [0, 4], sizes = [16, 840], strides = [1, 1]} : vector<16x844xbf16> to vector<16x840xbf16>
    %35 = tpu.concatenate %32, %33, %34 in 0 : vector<16x840xbf16>, vector<16x840xbf16>, vector<16x840xbf16> -> vector<48x840xbf16>
    %c0_30 = arith.constant 0 : index
    %c0_31 = arith.constant 0 : index
    %36 = vector.load %arg4[%c0_30, %c0_31] : memref<32x48xbf16, #tpu.memory_space<vmem>>, vector<32x48xbf16>
    %cst_32 = arith.constant dense<0.000000e+00> : vector<32x840xf32>
    %37 = tpu.matmul %36, %35, %cst_32 {dimension_numbers = #tpu.dot_dimension_numbers<[1], [0], [0], [1], [0, 0, 1, 1], [], []>} : vector<32x48xbf16>, vector<48x840xbf16>, vector<32x840xf32> -> vector<32x840xf32>
    %c0_33 = arith.constant 0 : index
    %c0_34 = arith.constant 0 : index
    %38 = vector.load %arg5[%c0_33, %c0_34] : memref<32x1xf32, #tpu.memory_space<vmem>>, vector<32x1xf32>
    %39 = vector.broadcast %38 : vector<32x1xf32> to vector<32x840xf32>
    %40 = arith.addf %37, %39 : vector<32x840xf32>
    %cst_35 = arith.constant 0.000000e+00 : f32
    %41 = vector.broadcast %cst_35 : f32 to vector<32x840xf32>
    %42 = arith.maximumf %40, %41 : vector<32x840xf32>
    %c0_i32_36 = arith.constant 0 : i32
    %c0_i32_37 = arith.constant 0 : i32
    %c0_i32_38 = arith.constant 0 : i32
    %43 = tpu.memref_slice %arg10[%c0_i32_36, %c0_i32_37, %c0_i32_38] : memref<1x32x896xf32, #tpu.memory_space<vmem>> -> memref<1x32x896xf32, #tpu.memory_space<vmem>>
    %44 = tpu.memref_squeeze %43 : memref<1x32x896xf32, #tpu.memory_space<vmem>> -> memref<32x896xf32, #tpu.memory_space<vmem>>
    %c0_39 = arith.constant 0 : index
    %c0_40 = arith.constant 0 : index
    %45 = vector.load %44[%c0_39, %c0_40] : memref<32x896xf32, #tpu.memory_space<vmem>>, vector<32x840xf32>
    tpu.vector_store %44[%c0_39, %c0_40], %42 {strides = array<i32>} : memref<32x896xf32, #tpu.memory_space<vmem>>, vector<32x840xf32>,
    %cst_41 = arith.constant 0.000000e+00 : f32
    %46 = vector.broadcast %cst_41 : f32 to vector<32x56xf32>
    %c0_i32_42 = arith.constant 0 : i32
    %c0_i32_43 = arith.constant 0 : i32
    %c0_i32_44 = arith.constant 0 : i32
    %47 = tpu.memref_slice %arg10[%c0_i32_42, %c0_i32_43, %c0_i32_44] : memref<1x32x896xf32, #tpu.memory_space<vmem>> -> memref<1x32x896xf32, #tpu.memory_space<vmem>>
    %48 = tpu.memref_squeeze %47 : memref<1x32x896xf32, #tpu.memory_space<vmem>> -> memref<32x896xf32, #tpu.memory_space<vmem>>
    %c0_45 = arith.constant 0 : index
    %c840 = arith.constant 840 : index
    %49 = vector.load %48[%c0_45, %c840] : memref<32x896xf32, #tpu.memory_space<vmem>>, vector<32x56xf32>
    tpu.vector_store %48[%c0_45, %c840], %46 {strides = array<i32>} : memref<32x896xf32, #tpu.memory_space<vmem>>, vector<32x56xf32>,
    %c0_i32_46 = arith.constant 0 : i32
    %c0_i32_47 = arith.constant 0 : i32
    %c0_i32_48 = arith.constant 0 : i32
    %50 = tpu.memref_slice %arg10[%c0_i32_46, %c0_i32_47, %c0_i32_48] : memref<1x32x896xf32, #tpu.memory_space<vmem>> -> memref<1x32x896xf32, #tpu.memory_space<vmem>>
    %51 = tpu.memref_squeeze %50 : memref<1x32x896xf32, #tpu.memory_space<vmem>> -> memref<32x896xf32, #tpu.memory_space<vmem>>
    %c0_49 = arith.constant 0 : index
    %c0_50 = arith.constant 0 : index
    %52 = vector.load %51[%c0_49, %c0_50] : memref<32x896xf32, #tpu.memory_space<vmem>>, vector<32x840xf32>
    %c0_i32_51 = arith.constant 0 : i32
    %c0_i32_52 = arith.constant 0 : i32
    %c0_i32_53 = arith.constant 0 : i32
    %53 = tpu.memref_slice %arg10[%c0_i32_51, %c0_i32_52, %c0_i32_53] : memref<1x32x896xf32, #tpu.memory_space<vmem>> -> memref<1x32x896xf32, #tpu.memory_space<vmem>>
    %54 = tpu.memref_squeeze %53 : memref<1x32x896xf32, #tpu.memory_space<vmem>> -> memref<32x896xf32, #tpu.memory_space<vmem>>
    %c0_54 = arith.constant 0 : index
    %c2_55 = arith.constant 2 : index
    %55 = vector.load %54[%c0_54, %c2_55] : memref<32x896xf32, #tpu.memory_space<vmem>>, vector<32x840xf32>
    %56 = arith.maximumf %52, %55 : vector<32x840xf32>
    %c0_56 = arith.constant 0 : index
    %c0_57 = arith.constant 0 : index
    %c0_58 = arith.constant 0 : index
    %57 = vector.load %arg6[%c0_56, %c0_57, %c0_58] : memref<2x32x840xbf16, #tpu.memory_space<vmem>>, vector<1x32x840xbf16>
    %58 = vector.shape_cast %57 : vector<1x32x840xbf16> to vector<32x840xbf16>
    %59 = arith.extf %58 : vector<32x840xbf16> to vector<32x840xf32>
    %60 = arith.mulf %59, %56 : vector<32x840xf32>
    %61 = vector.shape_cast %60 : vector<32x840xf32> to vector<1x32x840xf32>
    %cst_59 = arith.constant dense<0.000000e+00> : vector<1xf32>
    %62 = vector.multi_reduction <add>, %61, %cst_59 [1, 2] : vector<1x32x840xf32> to vector<1xf32>
    %63 = vector.shape_cast %62 : vector<1xf32> to vector<1x1x1xf32>
    %64 = vector.extract %63[0, 0, 0] : f32 from vector<1x1x1xf32>
    %65 = vector.broadcast %64 : f32 to vector<1x1xf32>
    %c1_60 = arith.constant 1 : index
    %c0_61 = arith.constant 0 : index
    %c0_62 = arith.constant 0 : index
    %66 = vector.load %arg6[%c1_60, %c0_61, %c0_62] : memref<2x32x840xbf16, #tpu.memory_space<vmem>>, vector<1x32x840xbf16>
    %67 = vector.shape_cast %66 : vector<1x32x840xbf16> to vector<32x840xbf16>
    %68 = arith.extf %67 : vector<32x840xbf16> to vector<32x840xf32>
    %69 = arith.mulf %68, %56 : vector<32x840xf32>
    %70 = vector.shape_cast %69 : vector<32x840xf32> to vector<1x32x840xf32>
    %cst_63 = arith.constant dense<0.000000e+00> : vector<1xf32>
    %71 = vector.multi_reduction <add>, %70, %cst_63 [1, 2] : vector<1x32x840xf32> to vector<1xf32>
    %72 = vector.shape_cast %71 : vector<1xf32> to vector<1x1x1xf32>
    %73 = vector.extract %72[0, 0, 0] : f32 from vector<1x1x1xf32>
    %74 = vector.broadcast %73 : f32 to vector<1x1xf32>
    %75 = tpu.concatenate %65, %74 in 1 : vector<1x1xf32>, vector<1x1xf32> -> vector<1x2xf32>
    %76 = vector.shape_cast %75 : vector<1x2xf32> to vector<2xf32>
    %c0_64 = arith.constant 0 : index
    %c0_65 = arith.constant 0 : index
    %77 = vector.load %arg7[%c0_64, %c0_65] : memref<1x2xf32, #tpu.memory_space<vmem>>, vector<1x2xf32>
    %78 = vector.shape_cast %77 : vector<1x2xf32> to vector<2xf32>
    %79 = arith.addf %76, %78 : vector<2xf32>
    %c0_66 = arith.constant 0 : index
    %c0_67 = arith.constant 0 : index
    %c0_68 = arith.constant 0 : index
    %80 = vector.load %arg8[%c0_66, %c0_67, %c0_68] : memref<1x1x2xf32, #tpu.memory_space<vmem>>, vector<1x1x2xf32>
    %81 = vector.shape_cast %80 : vector<1x1x2xf32> to vector<2xf32>
    %82 = vector.shape_cast %79 : vector<2xf32> to vector<1x1x2xf32>
    tpu.vector_store %arg8[%c0_66, %c0_67, %c0_68], %82 {strides = array<i32>} : memref<1x1x2xf32, #tpu.memory_space<vmem>>, vector<1x1x2xf32>,
    return
  }
  func.func @transform_0(%arg0: i32) -> (i32, i32, i32) {
    %c0_i32 = arith.constant 0 : i32
    %c0_i32_0 = arith.constant 0 : i32
    %c0_i32_1 = arith.constant 0 : i32
    return %arg0, %c0_i32, %c0_i32_0 : i32, i32, i32
  }
  func.func @transform_1(%arg0: i32) -> (i32, i32) {
    %c0_i32 = arith.constant 0 : i32
    %c0_i32_0 = arith.constant 0 : i32
    %c0_i32_1 = arith.constant 0 : i32
    return %c0_i32, %c0_i32_0 : i32, i32
  }
  func.func @transform_2(%arg0: i32) -> (i32, i32) {
    %c0_i32 = arith.constant 0 : i32
    %c0_i32_0 = arith.constant 0 : i32
    %c0_i32_1 = arith.constant 0 : i32
    return %c0_i32, %c0_i32_0 : i32, i32
  }
  func.func @transform_3(%arg0: i32) -> (i32, i32) {
    %c0_i32 = arith.constant 0 : i32
    %c0_i32_0 = arith.constant 0 : i32
    %c0_i32_1 = arith.constant 0 : i32
    return %c0_i32, %c0_i32_0 : i32, i32
  }
  func.func @transform_4(%arg0: i32) -> (i32, i32) {
    %c0_i32 = arith.constant 0 : i32
    %c0_i32_0 = arith.constant 0 : i32
    %c0_i32_1 = arith.constant 0 : i32
    return %c0_i32, %c0_i32_0 : i32, i32
  }
  func.func @transform_5(%arg0: i32) -> (i32, i32, i32) {
    %c0_i32 = arith.constant 0 : i32
    %c0_i32_0 = arith.constant 0 : i32
    %c0_i32_1 = arith.constant 0 : i32
    %c0_i32_2 = arith.constant 0 : i32
    return %c0_i32, %c0_i32_0, %c0_i32_1 : i32, i32, i32
  }
  func.func @transform_6(%arg0: i32) -> (i32, i32) {
    %c0_i32 = arith.constant 0 : i32
    %c0_i32_0 = arith.constant 0 : i32
    %c0_i32_1 = arith.constant 0 : i32
    return %c0_i32, %c0_i32_0 : i32, i32
  }
  func.func @transform_7(%arg0: i32) -> (i32, i32, i32) {
    %c0_i32 = arith.constant 0 : i32
    %c0_i32_0 = arith.constant 0 : i32
    %c0_i32_1 = arith.constant 0 : i32
    return %arg0, %c0_i32, %c0_i32_0 : i32, i32, i32
  }
}

</mosaic_0001>

<bundles_post_ra>
// kernel: cnn_forward.1
= control target key start
LH: loop header
LB: loop body
LE: loop exit
PB: predicated region body
PF: predicated region fallthrough
CT: control target
= control target key end

     0   :  { %12 = vsyncpa [#allocation5], 0  ;;  %s2665_s0 = inlined_call_operand.vmem [shape: bf16[2,16,842], index: 0, kind: input, shape index: {}]   ;;  %s2666_s1 = inlined_call_operand.vmem [shape: bf16[16,48], index: 1, kind: input, shape index: {}]   ;;  %s2667_s2 = inlined_call_operand.vmem [shape: f32[16,1], index: 2, kind: input, shape index: {}]   ;;  %s2668_s3 = inlined_call_operand.vmem [shape: bf16[32,48], index: 3, kind: input, shape index: {}]   ;;  %s2669_s4 = inlined_call_operand.vmem [shape: f32[32,1], index: 4, kind: input, shape index: {}]   ;;  %s2670_s5 = inlined_call_operand.vmem [shape: bf16[2,32,840], index: 5, kind: input, shape index: {}]   ;;  %s2671_s6 = inlined_call_operand.vmem [shape: f32[1,2], index: 6, kind: input, shape index: {}]   ;;  %s2672_s7 = inlined_call_operand.hbm [shape: f32[2,1,2], index: 7, kind: output, shape index: {}]  }
   0x1   :  { %14 = vsyncpa [#allocation5 + $0x1], 0  ;;  %s1936_s24 = smov 0   ;;  %s1938_s25 = smov 0  }
   0x2   :  { %s1940_s26 = smov 0   ;;  %s1942_s27 = smov 0  }
   0x3 LB: > { %s1957_s28 = sadd.s32 4294967295, %s1886_s27   ;;  %s1648_s29 = sadd.s32 4294967294, %s1886_s27   ;;  %s1886_s27 = sphi %s1942_s27, %s2704_s27   ;;  %s1882_s26 = sphi %s1940_s26, %s2703_s26   ;;  %s1878_s25 = sphi %s1938_s25, %s2702_s25   ;;  %s1874_s24 = sphi %s1936_s24, %s2701_s24  }
   0x4   : > { %s1961_s30 = sadd.s32 1, %s1886_s27   ;;  %s179_s8 = sadd.s32 1, %s1882_s26 }
   0x5   : > { %s176_s9 = ssub.s32 %s1886_s27, %s1961_s30  ;;  %p189_p0 = scmp.ne.s32.totalorder %s1882_s26, %s1878_s25 }
   0x6   : > { %p177_p1 = scmp.eq.s32.totalorder %s176_s9, 0  ;;  %p190_p2 = scmp.eq.s32.totalorder %s1957_s28, 1 }
   0x7   : > { %p195_p3 = scmp.ne.s32.totalorder %s1878_s25, %s1874_s24  ;;  %p196_p4 = scmp.eq.s32.totalorder %s1648_s29, 1 }
   0x8   : > { %s1972_s10 = scalar_select %p177_p1, %s1882_s26, %s179_s8  }
   0x9   : > { %p1974_p5 = por %p190_p2, %p189_p0  ;;  %p1978_p6 = por %p196_p4, %p195_p3 }
   0xa   : > { %p1651_p7 = scmp.ge.s32.totalorder %s1886_s27, 1  ;;  %p240_p8 = scmp.lt.s32.totalorder %s1886_s27, 3 }
   0xc   : > { %p241_p9 = pnand %p1651_p7, %p240_p8 }
   0xd   : > { %p271_p10 = scmp.lt.s32.totalorder (!%p241_p9), %s1957_s28, 1  ;;  %s1888_s18 = smov (!%p241_p9), 127   ;;  %v1889_v4 = vmov (!%p241_p9), 0   ;;  %v382_v8 = vld [vmem:[%s2667_s2] sm:$0xff] (!%p241_p9)  ;;  %v383_v9 = vld [vmem:[%s2667_s2 + $0x8] sm:$0xff] (!%p241_p9)  ;;  %vm335_vm0 = vcmask (!%p241_p9), 1039360  }
   0xe   : > { %244 = sbr.rel (%p241_p9) target bundleno = 1412 (0x584), region = 48  ;;  %435 = vmatprep.mubr.bf16.mxu0 (!%p241_p9), %v1889_v4  ;;  %478 = vmatprep.mubr.bf16.mxu1 (!%p241_p9), %v1889_v4  ;;  %s1890_s19 = smov (!%p241_p9), 126   ;;  %vm363_vm1 = vcmask (!%p241_p9), 1031168   ;;  %v1821_v20 = vld [vmem:[%s2666_s1] sm:$0xff] (!%p241_p9)   ;;  %vm399_vm2 = vcmask (!%p241_p9), 392192   ;;  %v1891_v36 = vmov (!%p241_p9), 0.0  }
   0xf   : > { %1775 = vset.pattern.permute.xlu1 (!%p241_p9), %v1889_v4  ;;  %1774 = vset.pattern.permute.xlu0 (!%p241_p9), %v1889_v4  ;;  %vm1892_vm3 = vmmov (!%p241_p9), 0   ;;  %vm379_vm4 = vcmask (!%p241_p9), 15360   ;;  %s1893_s9 = smov (!%p241_p9), 2   ;;  %vm655_vm5 = vcmask (!%p241_p9), 1047568   ;;  %vm662_vm6 = vcmask (!%p241_p9), 605184   ;;  %s1691_s15 = sshll.u32 (!%p241_p9), %s1957_s28, 4 }
  0x10   : > { %380 = vst.msk [vmem:[#allocation2] sm:$0xff] (!%p241_p9), %vm379_vm4, %v1891_v36  ;;  %381 = vst.msk [vmem:[#allocation2 + $0x38] sm:$0xff] (!%p241_p9), %vm379_vm4, %v1891_v36  ;;  %vm671_vm7 = vcmask (!%p241_p9), 1048144   ;;  %vm826_vm8 = vcmask (!%p241_p9), 1014784   ;;  %vm1126_vm9 = vcmask (!%p241_p9), 588800   ;;  %vm1149_vm10 = vcmask (!%p241_p9), 1048128   ;;  %s2623_s23 = scalar_lea.hbm (!%p241_p9), %s2672_s7, %s1691_s15 }
  0x11   : > { %vm1574_vm11 = vcmask (!%p241_p9), 7168   ;;  %vm1578_vm12 = vcmask (!%p241_p9), 8192   ;;  %s1895_s8 = smov (!%p241_p9), [#allocation4]  }
  0x15   : > { %s272_s13 = scalar_select %p271_p10, %s1957_s28, 1 }
  0x17   : > { %s1723_s14 = smul.u32 56, %s272_s13  ;;  %s1894_s13 = smov 124  }
  0x19   : > { %s275_s17 = scalar_lea.vmem %s2665_s0, %s1723_s14 }
  0x1a   : > { %v1811_v0 = vld [vmem:[%s275_s17 + $0x4] ss:$28 sps:$4 sm:$0xff]   ;;  %v1816_v3 = vld [vmem:[%s275_s17 + $0xc] ss:$28 sps:$4 sm:$0xff]   ;;  %v1819_v6 = vld [vmem:[%s275_s17 + $0x14] ss:$28 sps:$4 sm:$0xff]  }
  0x1b   : > { %v1813_v1 = vld [vmem:[%s275_s17] ss:$28 sps:$4 sm:$0xff]   ;;  %323 = vrot.lane.b32.xlu0 %v1811_v0, %s1888_s18  ;;  %v1814_v2 = vld [vmem:[%s275_s17 + $0x8] ss:$28 sps:$4 sm:$0xff]   ;;  %403 = vmatprep.subr.bf16.mxu0 %v1811_v0  ;;  %v1817_v5 = vld [vmem:[%s275_s17 + $0x10] ss:$28 sps:$4 sm:$0xff]  }
  0x1c   : > { %321 = vrot.lane.b32.xlu1 %v1813_v1, %s1888_s18  ;;  %404 = vmatpush1.bf16.msra.mxu0 %v1813_v1  ;;  %v1820_v7 = vld [vmem:[%s275_s17 + $0x18] ss:$28 sps:$4 sm:$0xff]  }
  0x1d   : > { %446 = vmatprep.subr.bf16.mxu1 %v1816_v3 }
  0x1e   : > { %447 = vmatpush1.bf16.msra.mxu1 %v1814_v2 }
  0x1f   : > { %325 = vrot.lane.b32.xlu0 %v1814_v2, %s1888_s18 }
  0x20   : > { %351 = vrot.lane.b32.xlu1 %v1811_v0, %s1890_s19 }
  0x23   : > { %353 = vrot.lane.b32.xlu0 %v1814_v2, %s1890_s19 }
  0x24   : > { %349 = vrot.lane.b32.xlu1 %v1813_v1, %s1890_s19 }
  0x27   : > { %327 = vrot.lane.b32.xlu0 %v1816_v3, %s1888_s18 }
  0x28   : > { %329 = vrot.lane.b32.xlu1 %v1817_v5, %s1888_s18 }
  0x2b   : > { %331 = vrot.lane.b32.xlu0 %v1819_v6, %s1888_s18 }
  0x2c   : > { %333 = vrot.lane.b32.xlu1 %v1820_v7, %s1888_s18 }
  0x2f   : > { %355 = vrot.lane.b32.xlu0 %v1816_v3, %s1890_s19 }
  0x30   : > { %357 = vrot.lane.b32.xlu1 %v1817_v5, %s1890_s19 }
  0x33   : > { %359 = vrot.lane.b32.xlu0 %v1819_v6, %s1890_s19 }
  0x34   : > { %361 = vrot.lane.b32.xlu1 %v1820_v7, %s1890_s19 }
  0x37   : > { %386 = vperm.xlu0 %1774, %v382_v8  }
  0x38   : > { %391 = vperm.xlu1 %1775, %v383_v9  }
  0x8d   : > { %v324_v10 = vpop.permute.xlu0 %323 }
  0x8e   : > { %v322_v11 = vpop.permute.xlu1 %321 }
  0x8f   : > { %v336_v15 = vsel %vm335_vm0, %v322_v11, %v324_v10 }
  0x91   : > { %v326_v12 = vpop.permute.xlu0 %325 }
  0x92   : > { %v352_v13 = vpop.permute.xlu1 %351  ;;  %v337_v14 = vsel %vm335_vm0, %v324_v10, %v326_v12 }
  0x93   : > { %405 = vmatprep.subr.bf16.mxu0 %v337_v14 }
  0x94   : > { %406 = vmatpush1.bf16.msra.mxu0 %v336_v15 }
  0x95   : > { %v354_v16 = vpop.permute.xlu0 %353 }
  0x96   : > { %v350_v17 = vpop.permute.xlu1 %349  ;;  %v365_v18 = vsel %vm363_vm1, %v352_v13, %v354_v16 }
  0x97   : > { %407 = vmatprep.subr.bf16.mxu0 %v365_v18  ;;  %v364_v19 = vsel %vm363_vm1, %v350_v17, %v352_v13 }
  0x98   : > { %408 = vmatpush1.bf16.msra.mxu0 %v364_v19 }
  0x99   : > { %v328_v21 = vpop.permute.xlu0 %327  ;;  %489 = vmatprep.subr.bf16.mxu0 %v1819_v6 }
  0x9a   : > { %v330_v22 = vpop.permute.xlu1 %329  ;;  %v338_v23 = vsel %vm335_vm0, %v326_v12, %v328_v21 }
  0x9b   : > { %v339_v24 = vsel %vm335_vm0, %v328_v21, %v330_v22  ;;  %1661 = vmatmul.mubr.msk.bf16.vlgmr.msra.gmra.mrb[0].mxu0 %vm399_vm2, %v1821_v20 }
  0x9c   : > { %448 = vmatprep.subr.bf16.mxu1 %v339_v24  ;;  %490 = vmatpush1.bf16.msra.mxu0 %v1817_v5 }
  0x9d   : > { %449 = vmatpush1.bf16.msra.mxu1 %v338_v23  ;;  %v332_v25 = vpop.permute.xlu0 %331  ;;  %521 = vmatprep.mubr.bf16.mxu0 %v1889_v4 }
  0x9e   : > { %v340_v26 = vsel %vm335_vm0, %v330_v22, %v332_v25  ;;  %v334_v27 = vpop.permute.xlu1 %333 }
  0x9f   : > { %v341_v28 = vsel %vm335_vm0, %v332_v25, %v334_v27 }
  0xa0   : > { %491 = vmatprep.subr.bf16.mxu0 %v341_v28 }
  0xa1   : > { %492 = vmatpush1.bf16.msra.mxu0 %v340_v26  ;;  %v356_v29 = vpop.permute.xlu0 %355 }
  0xa2   : > { %v358_v30 = vpop.permute.xlu1 %357  ;;  %v366_v31 = vsel %vm363_vm1, %v354_v16, %v356_v29 }
  0xa3   : > { %v367_v32 = vsel %vm363_vm1, %v356_v29, %v358_v30 }
  0xa4   : > { %450 = vmatprep.subr.bf16.mxu1 %v367_v32 }
  0xa5   : > { %451 = vmatpush1.bf16.msra.mxu1 %v366_v31  ;;  %v360_v33 = vpop.permute.xlu0 %359 }
  0xa6   : > { %v368_v34 = vsel %vm363_vm1, %v358_v30, %v360_v33  ;;  %v362_v35 = vpop.permute.xlu1 %361  ;;  %1703 = vmatprep.subr.bf16.mxu1 %v1891_v36 }
  0xa7   : > { %v369_v37 = vsel %vm363_vm1, %v360_v33, %v362_v35 }
  0xa8   : > { %1662 = vmatmul.mubr.msk.bf16.vlgmr.msra.gmra.mrb[0].mxu1 %vm399_vm2, %v1821_v20  ;;  %493 = vmatprep.subr.bf16.mxu0 %v369_v37 }
  0xa9   : > { %494 = vmatpush1.bf16.msra.mxu0 %v368_v34  ;;  %1704 = vmatpush3.bf16.msra.mxu1 %v1820_v7 }
  0xaa   : > { %1705 = vmatprep.subr.bf16.mxu1 %v1891_v36  ;;  %1709 = vmatprep.mubr.msk.bf16.mxu1 %vm1892_vm3, %v1891_v36 }
  0xac   : > { %1663 = vmatmul.mubr.msk.bf16.vlgmr.msra.gmra.mrb[4].mxu0 %vm399_vm2, %v1821_v20 }
  0xad   : > { %1706 = vmatpush3.bf16.msra.mxu1 %v334_v27  ;;  %916 = vmatprep.mubr.bf16.mxu0 %v1889_v4 }
  0xae   : > { %1707 = vmatprep.subr.bf16.mxu1 %v1891_v36 }
  0xb1   : > { %1708 = vmatpush3.bf16.msra.mxu1 %v362_v35 }
  0xb4   : > { %1710 = vmatmul.mubr.msk.bf16.vlgmr.msra.gmra.mrb[4].mxu1 %vm399_vm2, %v1821_v20 }
  0xb5   : > { %969 = vmatprep.mubr.bf16.mxu1 %v1889_v4 }
  0xb6   : > { %v387_v38 = vpop.permute.xlu0 %386 }
  0xb7   : > { %v392_v47 = vpop.permute.xlu1 %391 }
 0x16e   : > { %v437_v39 = vpop.f32.mrb[0].mxu0 }
 0x16f   : > { %v439_v40 = vpop.f32.mrb[1].mxu0  ;;  %v438_v41 = vadd.f32 %v437_v39, %v387_v38 }
 0x170   : > { %v441_v42 = vpop.f32.mrb[2].mxu0  ;;  %v440_v43 = vadd.f32 %v439_v40, %v387_v38 }
 0x171   : > { %v443_v44 = vpop.f32.mrb[3].mxu0  ;;  %v573_v45 = vmax.f32 %v438_v41, 0.0  ;;  %v442_v55 = vadd.f32 %v441_v42, %v392_v47 }
 0x172   : > { %v574_v46 = vmax.f32 %v440_v43, 0.0  ;;  %v444_v56 = vadd.f32 %v443_v44, %v392_v47 }
 0x173   : > { %601 = vrot.lane.b32.xlu1 %v573_v45, %s1893_s9  ;;  %v580_v63 = vmax.f32 %v442_v55, 0.0 }
 0x174   : > { %603 = vrot.lane.b32.xlu0 %v574_v46, %s1893_s9  ;;  %v581_v0 = vmax.f32 %v444_v56, 0.0 }
 0x17b   : > { %v480_v48 = vpop.f32.mrb[0].mxu1 }
 0x17c   : > { %v481_v49 = vadd.f32 %v480_v48, %v387_v38  ;;  %v482_v50 = vpop.f32.mrb[1].mxu1 }
 0x17d   : > { %v483_v51 = vadd.f32 %v482_v50, %v387_v38  ;;  %v484_v52 = vpop.f32.mrb[2].mxu1 }
 0x17e   : > { %v575_v53 = vmax.f32 %v481_v49, 0.0  ;;  %v486_v54 = vpop.f32.mrb[3].mxu1  ;;  %v485_v61 = vadd.f32 %v484_v52, %v392_v47 }
 0x17f   : > { %v576_v57 = vmax.f32 %v483_v51, 0.0  ;;  %v523_v58 = vpop.f32.mrb[4].mxu0  ;;  %v487_v1 = vadd.f32 %v486_v54, %v392_v47 }
 0x180   : > { %v525_v59 = vpop.f32.mrb[5].mxu0  ;;  %605 = vrot.lane.b32.xlu1 %v575_v53, %s1893_s9  ;;  %v582_v2 = vmax.f32 %v485_v61, 0.0  ;;  %v524_v3 = vadd.f32 %v523_v58, %v387_v38 }
 0x181   : > { %v527_v60 = vpop.f32.mrb[6].mxu0  ;;  %607 = vrot.lane.b32.xlu0 %v576_v57, %s1893_s9  ;;  %v583_v5 = vmax.f32 %v487_v1, 0.0  ;;  %v526_v6 = vadd.f32 %v525_v59, %v387_v38 }
 0x182   : > { %v529_v62 = vpop.f32.mrb[7].mxu0  ;;  %v577_v10 = vmax.f32 %v524_v3, 0.0  ;;  %v528_v11 = vadd.f32 %v527_v60, %v392_v47 }
 0x183   : > { %v578_v13 = vmax.f32 %v526_v6, 0.0  ;;  %v530_v14 = vadd.f32 %v529_v62, %v392_v47 }
 0x184   : > { %615 = vrot.lane.b32.xlu1 %v580_v63, %s1893_s9  ;;  %v584_v15 = vmax.f32 %v528_v11, 0.0 }
 0x185   : > { %617 = vrot.lane.b32.xlu0 %v581_v0, %s1893_s9  ;;  %v585_v17 = vmax.f32 %v530_v14, 0.0 }
 0x187   : > { %v566_v7 = vpop.f32.mrb[4].mxu1 }
 0x188   : > { %v1711_v8 = vpop.f32.mrb[5].mxu1  ;;  %619 = vrot.lane.b32.xlu1 %v582_v2, %s1893_s9  ;;  %v567_v16 = vadd.f32 %v566_v7, %v387_v38 }
 0x189   : > { %v569_v9 = vpop.f32.mrb[6].mxu1  ;;  %621 = vrot.lane.b32.xlu0 %v583_v5, %s1893_s9 }
 0x18a   : > { %v1712_v12 = vpop.f32.mrb[7].mxu1  ;;  %v570_v18 = vadd.f32 %v569_v9, %v392_v47  ;;  %v579_v19 = vmax.f32 %v567_v16, 0.0 }
 0x18c   : > { %609 = vrot.lane.b32.xlu1 %v577_v10, %s1893_s9  ;;  %v586_v20 = vmax.f32 %v570_v18, 0.0 }
 0x18d   : > { %611 = vrot.lane.b32.xlu0 %v578_v13, %s1893_s9 }
 0x190   : > { %623 = vrot.lane.b32.xlu1 %v584_v15, %s1893_s9 }
 0x191   : > { %625 = vrot.lane.b32.xlu0 %v585_v17, %s1893_s9 }
 0x194   : > { %613 = vrot.lane.b32.xlu1 %v579_v19, %s1893_s9 }
 0x195   : > { %627 = vrot.lane.b32.xlu0 %v586_v20, %s1893_s9  ;;  %s1828_s9 = sshll.u32 %s1895_s8, 4  ;;  %s1829_s9 = int_to_ptr.vmem [resolvable:$false] %s1828_s9 }
 0x1e5   : > { %v602_v21 = vpop.permute.xlu1 %601 }
 0x1e6   : > { %v604_v22 = vpop.permute.xlu0 %603  ;;  %656 = vst.msk [vmem:[#allocation2] sm:$0xff] %vm655_vm5, %v602_v21 }
 0x1e7   : > { %v2058_v23 = vsel %vm379_vm4, %v602_v21, %v604_v22 }
 0x1ed   : > { %v2080_v39 = vld [vmem:[#allocation2] sm:$0xff] }
 0x1f2   : > { %v606_v24 = vpop.permute.xlu1 %605 }
 0x1f3   : > { %v2061_v25 = vsel %vm379_vm4, %v604_v22, %v606_v24  ;;  %v608_v26 = vpop.permute.xlu0 %607 }
 0x1f4   : > { %v2064_v27 = vsel %vm379_vm4, %v606_v24, %v608_v26  ;;  %v1776_v28 = vpack.i.bf16 %v2061_v25, %v2058_v23 }
 0x1f6   : > { %v616_v29 = vpop.permute.xlu1 %615  ;;  %1777 = vrot.lane.b32.xlu1 %v1776_v28, %s1888_s18 }
 0x1f7   : > { %664 = vst.msk [vmem:[#allocation2 + $0x38] sm:$0xff] %vm655_vm5, %v616_v29  ;;  %v618_v30 = vpop.permute.xlu0 %617 }
 0x1f8   : > { %v2070_v31 = vsel %vm379_vm4, %v616_v29, %v618_v30 }
 0x1f9   : > { %v1786_v49 = vpack.i.bf16 %v2070_v31, %v2064_v27 }
 0x1fa   : > { %v620_v32 = vpop.permute.xlu1 %619 }
 0x1fb   : > { %v2073_v33 = vsel %vm379_vm4, %v618_v30, %v620_v32  ;;  %v622_v34 = vpop.permute.xlu0 %621 }
 0x1fc   : > { %v2076_v35 = vsel %vm379_vm4, %v620_v32, %v622_v34 }
 0x1fd   : > { %v1791_v37 = vpack.i.bf16 %v2076_v35, %v2073_v33 }
 0x1fe   : > { %v610_v38 = vpop.permute.xlu1 %609  ;;  %v2082_v40 = vld [vmem:[#allocation2 + $0x38] sm:$0xff] }
 0x1ff   : > { %v2085_v41 = vsel %vm379_vm4, %v608_v26, %v610_v38  ;;  %v612_v42 = vpop.permute.xlu0 %611  ;;  %v1781_v43 = vpack.i.bf16 %v2082_v40, %v2080_v39  ;;  %1792 = vrot.lane.b32.xlu1 %v1791_v37, %s1888_s18 }
 0x200   : > { %v2091_v44 = vsel %vm379_vm4, %v610_v38, %v612_v42 }
 0x201   : > { %1782 = vrot.lane.b32.xlu0 %v1781_v43, %s1888_s18  ;;  %v1796_v45 = vpack.i.bf16 %v2091_v44, %v2085_v41 }
 0x202   : > { %v624_v46 = vpop.permute.xlu1 %623 }
 0x203   : > { %v2097_v47 = vsel %vm379_vm4, %v622_v34, %v624_v46  ;;  %v626_v48 = vpop.permute.xlu0 %625  ;;  %1797 = vrot.lane.b32.xlu1 %v1796_v45, %s1888_s18 }
 0x204   : > { %v2103_v50 = vsel %vm379_vm4, %v624_v46, %v626_v48 }
 0x205   : > { %1787 = vrot.lane.b32.xlu0 %v1786_v49, %s1888_s18  ;;  %v1801_v54 = vpack.i.bf16 %v2103_v50, %v2097_v47 }
 0x206   : > { %v614_v51 = vpop.permute.xlu1 %613 }
 0x207   : > { %v634_v52 = vsel %vm379_vm4, %v612_v42, %v614_v51  ;;  %v628_v53 = vpop.permute.xlu0 %627 }
 0x208   : > { %663 = vst.msk [vmem:[#allocation2 + $0x30] sm:$0xff] %vm662_vm6, %v634_v52  ;;  %v640_v55 = vsel %vm379_vm4, %v626_v48, %v628_v53  ;;  %v845_v53 = vld [vmem:[%s2669_s4 + $0x8] sm:$0xff] }
 0x209   : > { %672 = vst.msk [vmem:[#allocation2 + $0x30] sm:$0xff] %vm671_vm7, %v1891_v36  ;;  %1802 = vrot.lane.b32.xlu0 %v1801_v54, %s1888_s18  ;;  %v846_v54 = vld [vmem:[%s2669_s4 + $0x10] sm:$0xff] }
 0x20a   : > { %670 = vst.msk [vmem:[#allocation2 + $0x68] sm:$0xff] %vm662_vm6, %v640_v55 }
 0x20b   : > { %673 = vst.msk [vmem:[#allocation2 + $0x68] sm:$0xff] %vm671_vm7, %v1891_v36 }
 0x210   : > { %v2113_v56 = vld [vmem:[#allocation2 + $0x30] sm:$0xff] }
 0x212   : > { %v2115_v57 = vld [vmem:[#allocation2 + $0x68] sm:$0xff] }
 0x213   : > { %v1806_v58 = vpack.i.bf16 %v2115_v57, %v2113_v56 }
 0x215   : > { %1807 = vrot.lane.b32.xlu1 %v1806_v58, %s1888_s18 }
 0x268   : > { %v1778_v59 = vpop.permute.xlu1 %1777 }
 0x269   : > { %v1780_v61 = vunpack.i.h.bf16 %v1778_v59  ;;  %v1779_v62 = vunpack.i.l.bf16 %v1778_v59 }
 0x26b   : > { %v732_v3 = vsel %vm335_vm0, %v1779_v62, %v1780_v61 }
 0x26c   : > { %v758_v13 = vmax.f32 %v2058_v23, %v732_v3 }
 0x271   : > { %v1793_v60 = vpop.permute.xlu1 %1792 }
 0x272   : > { %v1795_v63 = vunpack.i.h.bf16 %v1793_v60  ;;  %v1794_v0 = vunpack.i.l.bf16 %v1793_v60 }
 0x273   : > { %v1783_v1 = vpop.permute.xlu0 %1782 }
 0x274   : > { %v1784_v2 = vunpack.i.l.bf16 %v1783_v1  ;;  %v739_v5 = vsel %vm335_vm0, %v1794_v0, %v1795_v63  ;;  %v1785_v8 = vunpack.i.h.bf16 %v1783_v1  ;;  %v1822_v1 = vld [vmem:[%s2668_s3] sm:$0xff]  }
 0x275   : > { %v1798_v7 = vpop.permute.xlu1 %1797  ;;  %v766_v12 = vmax.f32 %v2073_v33, %v739_v5 }
 0x276   : > { %v731_v9 = vsel %vm335_vm0, %v1784_v2, %v1779_v62  ;;  %v1799_v17 = vunpack.i.l.bf16 %v1798_v7 }
 0x277   : > { %v1788_v6 = vpop.permute.xlu0 %1787  ;;  %v757_v18 = vmax.f32 %v2080_v39, %v731_v9 }
 0x278   : > { %v1790_v10 = vunpack.i.h.bf16 %v1788_v6  ;;  %v1789_v11 = vunpack.i.l.bf16 %v1788_v6 }
 0x27a   : > { %v737_v14 = vsel %vm335_vm0, %v1785_v8, %v1790_v10  ;;  %v733_v15 = vsel %vm335_vm0, %v1780_v61, %v1789_v11  ;;  %v738_v16 = vsel %vm335_vm0, %v1790_v10, %v1794_v0  ;;  %v734_v24 = vsel %vm335_vm0, %v1789_v11, %v1799_v17  ;;  %v1823_v11 = vld [vmem:[%s2668_s3 + $0x8] sm:$0xff]  }
 0x27b   : > { %v764_v19 = vmax.f32 %v2082_v40, %v737_v14  ;;  %v1803_v20 = vpop.permute.xlu0 %1802  ;;  %v759_v21 = vmax.f32 %v2061_v25, %v733_v15  ;;  %v765_v22 = vmax.f32 %v2070_v31, %v738_v16  ;;  %v760_v33 = vmax.f32 %v2064_v27, %v734_v24 }
 0x27c   : > { %v1804_v26 = vunpack.i.l.bf16 %v1803_v20  ;;  %v1805_v30 = vunpack.i.h.bf16 %v1803_v20  ;;  %v1800_v25 = vunpack.i.h.bf16 %v1798_v7 }
 0x27d   : > { %v773_v23 = vpack.c.bf16 %v766_v12, %v759_v21  ;;  %v772_v28 = vpack.c.bf16 %v765_v22, %v758_v13  ;;  %v771_v29 = vpack.c.bf16 %v764_v19, %v757_v18 }
 0x27e   : > { %v740_v32 = vsel %vm335_vm0, %v1795_v63, %v1804_v26  ;;  %v741_v37 = vsel %vm335_vm0, %v1804_v26, %v1805_v30  ;;  %v735_v38 = vsel %vm335_vm0, %v1799_v17, %v1800_v25 }
 0x27f   : > { %789 = vrot.lane.b32.xlu1 %v773_v23, %s1890_s19  ;;  %787 = vrot.lane.b32.xlu0 %v772_v28, %s1890_s19  ;;  %v767_v34 = vmax.f32 %v2076_v35, %v740_v32  ;;  %v768_v39 = vmax.f32 %v2097_v47, %v741_v37  ;;  %v761_v35 = vmax.f32 %v2085_v41, %v735_v38 }
 0x280   : > { %884 = vmatprep.subr.bf16.mxu0 %v772_v28 }
 0x281   : > { %885 = vmatpush1.bf16.msra.mxu0 %v771_v29  ;;  %v774_v31 = vpack.c.bf16 %v767_v34, %v760_v33  ;;  %v775_v43 = vpack.c.bf16 %v768_v39, %v761_v35 }
 0x283   : > { %814 = vrot.lane.b32.xlu1 %v772_v28, %s1894_s13  ;;  %785 = vrot.lane.b32.xlu0 %v771_v29, %s1890_s19 }
 0x284   : > { %937 = vmatprep.subr.bf16.mxu1 %v774_v31 }
 0x285   : > { %938 = vmatpush1.bf16.msra.mxu1 %v773_v23 }
 0x287   : > { %v1808_v40 = vpop.permute.xlu1 %1807  ;;  %812 = vrot.lane.b32.xlu1 %v771_v29, %s1894_s13  ;;  %816 = vrot.lane.b32.xlu0 %v773_v23, %s1894_s13 }
 0x288   : > { %v1810_v27 = vunpack.i.h.bf16 %v1808_v40  ;;  %v1809_v42 = vunpack.i.l.bf16 %v1808_v40 }
 0x28a   : > { %v742_v45 = vsel %vm335_vm0, %v1805_v30, %v1810_v27  ;;  %v736_v46 = vsel %vm335_vm0, %v1800_v25, %v1809_v42  ;;  %v770_v48 = vmax.f32 %v2115_v57, %v1810_v27  ;;  %v763_v49 = vmax.f32 %v2113_v56, %v1809_v42 }
 0x28b   : > { %791 = vrot.lane.b32.xlu1 %v774_v31, %s1890_s19  ;;  %793 = vrot.lane.b32.xlu0 %v775_v43, %s1890_s19  ;;  %v762_v47 = vmax.f32 %v2091_v44, %v736_v46  ;;  %v769_v51 = vmax.f32 %v2103_v50, %v742_v45  ;;  %v844_v44 = vld [vmem:[%s2669_s4] sm:$0xff]  ;;  %v847_v50 = vld [vmem:[%s2669_s4 + $0x18] sm:$0xff] }
 0x28c   : > { %v777_v52 = vpack.c.bf16 %v770_v48, %v763_v49 }
 0x28d   : > { %v776_v41 = vpack.c.bf16 %v769_v51, %v762_v47 }
 0x28f   : > { %820 = vrot.lane.b32.xlu1 %v775_v43, %s1894_s13  ;;  %818 = vrot.lane.b32.xlu0 %v774_v31, %s1894_s13 }
 0x293   : > { %797 = vrot.lane.b32.xlu1 %v777_v52, %s1890_s19  ;;  %795 = vrot.lane.b32.xlu0 %v776_v41, %s1890_s19 }
 0x297   : > { %824 = vrot.lane.b32.xlu1 %v777_v52, %s1894_s13  ;;  %822 = vrot.lane.b32.xlu0 %v776_v41, %s1894_s13  ;;  %s269_s13 = sand.u32 1, %s1878_s25  }
 0x298   : > { %s270_s18 = scalar_lea.vmem [#allocation4], %s269_s13  ;;  %s1581_s28 = scalar_lea.sflag [#allocation5], %s269_s13 }
 0x299   : > { %s1593_s20 = sshll.u32 %s270_s18, 4  ;;  %s2625_s20 = int_to_ptr.vmem [resolvable:$true] %s1593_s20 }
 0x29a   : > { %s1824_s29 = scalar_lea.vmem %s2625_s20, 16  ;;  %p1831_p0 = scmp.lt.s32.totalorder %s2625_s20, %s1829_s9 }
 0x29b   : > { %855 = vperm.xlu1 %1775, %v845_v53   ;;  %850 = vperm.xlu0 %1774, %v844_v44   ;;  %p1825_p11 = scmp.ne.s32.totalorder %s2625_s20, %s1824_s29 }
 0x29d   : > { %p1826_p12 = pnand %p1825_p11, %p1974_p5 }
 0x29f   : > { %865 = vperm.xlu1 %1775, %v847_v50   ;;  %860 = vperm.xlu0 %1774, %v846_v54   ;;  %p1827_p13 = pneg %p1826_p12 }
 0x2f1   : > { %v790_v55 = vpop.permute.xlu1 %789  ;;  %v788_v56 = vpop.permute.xlu0 %787 }
 0x2f2   : > { %v800_v57 = vsel %vm363_vm1, %v788_v56, %v790_v55 }
 0x2f3   : > { %886 = vmatprep.subr.bf16.mxu0 %v800_v57 }
 0x2f5   : > { %v815_v58 = vpop.permute.xlu1 %814  ;;  %v786_v59 = vpop.permute.xlu0 %785 }
 0x2f6   : > { %v799_v60 = vsel %vm363_vm1, %v786_v59, %v788_v56 }
 0x2f7   : > { %887 = vmatpush1.bf16.msra.mxu0 %v799_v60 }
 0x2f9   : > { %v813_v61 = vpop.permute.xlu1 %812  ;;  %v817_v62 = vpop.permute.xlu0 %816 }
 0x2fa   : > { %v827_v63 = vsel %vm826_vm8, %v813_v61, %v815_v58  ;;  %v828_v0 = vsel %vm826_vm8, %v815_v58, %v817_v62 }
 0x2fb   : > { %888 = vmatprep.subr.bf16.mxu0 %v828_v0 }
 0x2fc   : > { %889 = vmatpush1.bf16.msra.mxu0 %v827_v63 }
 0x2fd   : > { %v792_v2 = vpop.permute.xlu1 %791  ;;  %v794_v3 = vpop.permute.xlu0 %793  ;;  %990 = vmatprep.subr.bf16.mxu0 %v776_v41 }
 0x2fe   : > { %v801_v5 = vsel %vm363_vm1, %v790_v55, %v792_v2  ;;  %v802_v6 = vsel %vm363_vm1, %v792_v2, %v794_v3 }
 0x2ff   : > { %1667 = vmatmul.mubr.msk.bf16.vlgmr.msra.gmra.mrb[8].mxu0 %vm399_vm2, %v1822_v1  ;;  %939 = vmatprep.subr.bf16.mxu1 %v802_v6 }
 0x300   : > { %940 = vmatpush1.bf16.msra.mxu1 %v801_v5  ;;  %991 = vmatpush1.bf16.msra.mxu0 %v775_v43 }
 0x301   : > { %v821_v7 = vpop.permute.xlu1 %820  ;;  %v819_v8 = vpop.permute.xlu0 %818  ;;  %926 = vmatprep.mubr.bf16.mxu0 %v1889_v4 }
 0x302   : > { %v829_v9 = vsel %vm826_vm8, %v817_v62, %v819_v8  ;;  %v830_v10 = vsel %vm826_vm8, %v819_v8, %v821_v7 }
 0x303   : > { %941 = vmatprep.subr.bf16.mxu1 %v830_v10 }
 0x304   : > { %942 = vmatpush1.bf16.msra.mxu1 %v829_v9 }
 0x305   : > { %v798_v12 = vpop.permute.xlu1 %797  ;;  %1713 = vmatprep.subr.bf16.mxu1 %v777_v52  ;;  %v796_v13 = vpop.permute.xlu0 %795 }
 0x306   : > { %v803_v14 = vsel %vm363_vm1, %v794_v3, %v796_v13  ;;  %v804_v15 = vsel %vm363_vm1, %v796_v13, %v798_v12 }
 0x307   : > { %1668 = vmatmul.mubr.msk.bf16.gmra.mrb[12].mxu0 %vm399_vm2, %v1823_v11  ;;  %1669 = vmatmul.mubr.msk.bf16.vlgmr.msra.gmra.mrb[8].mxu1 %vm399_vm2, %v1822_v1 }
 0x308   : > { %992 = vmatprep.subr.bf16.mxu0 %v804_v15  ;;  %1714 = vmatpush3.bf16.msra.mxu1 %v777_v52 }
 0x309   : > { %993 = vmatpush1.bf16.msra.mxu0 %v803_v14  ;;  %v825_v16 = vpop.permute.xlu1 %824  ;;  %1715 = vmatprep.subr.bf16.mxu1 %v798_v12  ;;  %v823_v17 = vpop.permute.xlu0 %822 }
 0x30a   : > { %v831_v18 = vsel %vm826_vm8, %v821_v7, %v823_v17  ;;  %v832_v19 = vsel %vm826_vm8, %v823_v17, %v825_v16  ;;  %979 = vmatprep.mubr.bf16.mxu1 %v1889_v4  ;;  %1022 = vmatprep.mubr.bf16.mxu0 %v1889_v4 }
 0x30b   : > { %994 = vmatprep.subr.bf16.mxu0 %v832_v19 }
 0x30c   : > { %1716 = vmatpush3.bf16.msra.mxu1 %v798_v12 }
 0x30d   : > { %995 = vmatpush1.bf16.msra.mxu0 %v831_v18  ;;  %1717 = vmatprep.subr.bf16.mxu1 %v825_v16 }
 0x30f   : > { %1670 = vmatmul.mubr.msk.bf16.gmra.mrb[12].mxu1 %vm399_vm2, %v1823_v11 }
 0x310   : > { %1671 = vmatmul.mubr.msk.bf16.vlgmr.msra.gmra.mrb[16].mxu0 %vm399_vm2, %v1822_v1  ;;  %1718 = vmatpush3.bf16.msra.mxu1 %v825_v16 }
 0x311   : > { %1032 = vmatprep.mubr.bf16.mxu0 %v1889_v4  ;;  %1719 = vmatprep.mubr.msk.bf16.mxu1 %vm399_vm2, %v1822_v1 }
 0x317   : > { %1720 = vmatmul.mubr.msk.bf16.vlgmr.msra.gmra.mrb[16].mxu1 %vm399_vm2, %v1823_v11 }
 0x318   : > { %1672 = vmatmul.mubr.msk.bf16.gmra.mrb[20].mxu0 %vm399_vm2, %v1823_v11 }
 0x31a   : > { %v2195_v20 = vpop.permute.xlu0 %850  ;;  %v2197_v22 = vpop.permute.xlu1 %855 }
 0x31e   : > { %v2221_v31 = vpop.permute.xlu1 %865  ;;  %v2223_v37 = vpop.permute.xlu0 %860 }
 0x3d2   : > { %v918_v21 = vpop.f32.mrb[8].mxu0 }
 0x3d3   : > { %v2200_v24 = vadd.f32 %v918_v21, %v2195_v20  ;;  %v920_v26 = vpop.f32.mrb[9].mxu0 }
 0x3d4   : > { %v2203_v23 = vadd.f32 %v920_v26, %v2195_v20  ;;  %v922_v28 = vpop.f32.mrb[10].mxu0 }
 0x3d5   : > { %v1092_v4 = vmax.f32 %v2200_v24, 0.0  ;;  %v2207_v29 = vadd.f32 %v922_v28, %v2197_v22  ;;  %v924_v30 = vpop.f32.mrb[11].mxu0  ;;  %v1349_v24 = vld [vmem:[%s2670_s5 + $0x10] sm:$0xff] }
 0x3d6   : > { %v1093_v32 = vmax.f32 %v2203_v23, 0.0  ;;  %v2211_v33 = vadd.f32 %v924_v30, %v2197_v22 }
 0x3d7   : > { %v1099_v34 = vmax.f32 %v2207_v29, 0.0  ;;  %1210 = vrot.lane.b32.xlu0 %v1092_v4, %s1890_s19 }
 0x3d8   : > { %v1100_v25 = vmax.f32 %v2211_v33, 0.0  ;;  %1212 = vrot.lane.b32.xlu1 %v1093_v32, %s1890_s19 }
 0x3da   : > { %v928_v38 = vpop.f32.mrb[12].mxu0  ;;  %v971_v39 = vpop.f32.mrb[8].mxu1 }
 0x3db   : > { %v2226_v40 = vadd.f32 %v928_v38, %v2223_v37  ;;  %v2229_v27 = vadd.f32 %v971_v39, %v2195_v20  ;;  %v930_v42 = vpop.f32.mrb[13].mxu0  ;;  %v973_v35 = vpop.f32.mrb[9].mxu1 }
 0x3dc   : > { %v2232_v43 = vadd.f32 %v930_v42, %v2223_v37  ;;  %v2235_v45 = vadd.f32 %v973_v35, %v2195_v20  ;;  %v932_v46 = vpop.f32.mrb[14].mxu0  ;;  %v975_v48 = vpop.f32.mrb[10].mxu1 }
 0x3dd   : > { %v2684_v49 = vmax.f32 %v2226_v40, 0.0  ;;  %v1094_v47 = vmax.f32 %v2229_v27, 0.0  ;;  %v2240_v51 = vadd.f32 %v932_v46, %v2221_v31  ;;  %v2243_v52 = vadd.f32 %v975_v48, %v2197_v22  ;;  %v934_v41 = vpop.f32.mrb[15].mxu0  ;;  %v977_v53 = vpop.f32.mrb[11].mxu1 }
 0x3de   : > { %v2683_v44 = vmax.f32 %v2232_v43, 0.0  ;;  %v1095_v50 = vmax.f32 %v2235_v45, 0.0  ;;  %v2248_v54 = vadd.f32 %v934_v41, %v2221_v31  ;;  %v2251_v55 = vadd.f32 %v977_v53, %v2197_v22 }
 0x3df   : > { %v2678_v56 = vmax.f32 %v2240_v51, 0.0  ;;  %v1101_v57 = vmax.f32 %v2243_v52, 0.0  ;;  %1214 = vrot.lane.b32.xlu0 %v1094_v47, %s1890_s19  ;;  %v1683_v52 = vld [vmem:[%s2670_s5 + $0xa8] sm:$0xff] }
 0x3e0   : > { %v2677_v58 = vmax.f32 %v2248_v54, 0.0  ;;  %v1102_v59 = vmax.f32 %v2251_v55, 0.0  ;;  %1216 = vrot.lane.b32.xlu1 %v1095_v50, %s1890_s19  ;;  %v2507_v55 = vld [vmem:[%s2670_s5 + $0x40] sm:$0xff] }
 0x3e2   : > { %v981_v60 = vpop.f32.mrb[12].mxu1 }
 0x3e3   : > { %v2264_v61 = vadd.f32 %v981_v60, %v2223_v37  ;;  %v1024_v62 = vpop.f32.mrb[16].mxu0  ;;  %v983_v63 = vpop.f32.mrb[13].mxu1 }
 0x3e4   : > { %v2267_v0 = vadd.f32 %v1024_v62, %v2195_v20  ;;  %v2270_v1 = vadd.f32 %v983_v63, %v2223_v37  ;;  %v1026_v2 = vpop.f32.mrb[17].mxu0  ;;  %v985_v3 = vpop.f32.mrb[14].mxu1 }
 0x3e5   : > { %v2682_v5 = vmax.f32 %v2264_v61, 0.0  ;;  %v2274_v6 = vadd.f32 %v1026_v2, %v2195_v20  ;;  %v2277_v7 = vadd.f32 %v985_v3, %v2221_v31  ;;  %v1028_v8 = vpop.f32.mrb[18].mxu0  ;;  %v987_v9 = vpop.f32.mrb[15].mxu1 }
 0x3e6   : > { %v1096_v10 = vmax.f32 %v2267_v0, 0.0  ;;  %v2681_v11 = vmax.f32 %v2270_v1, 0.0  ;;  %v2282_v12 = vadd.f32 %v1028_v8, %v2197_v22  ;;  %v2285_v13 = vadd.f32 %v987_v9, %v2221_v31  ;;  %v1030_v14 = vpop.f32.mrb[19].mxu0 }
 0x3e7   : > { %v1097_v15 = vmax.f32 %v2274_v6, 0.0  ;;  %v2676_v16 = vmax.f32 %v2277_v7, 0.0  ;;  %v2290_v17 = vadd.f32 %v1030_v14, %v2197_v22  ;;  %v1680_v6 = vld [vmem:[%s2670_s5 + $0x94] sm:$0xff] }
 0x3e8   : > { %v1103_v18 = vmax.f32 %v2282_v12, 0.0  ;;  %v2675_v19 = vmax.f32 %v2285_v13, 0.0  ;;  %1218 = vrot.lane.b32.xlu0 %v1096_v10, %s1890_s19 }
 0x3e9   : > { %v2685_v21 = vmax.f32 %v2290_v17, 0.0  ;;  %1220 = vrot.lane.b32.xlu1 %v1097_v15, %s1890_s19 }
 0x3ea   : > { %v1721_v26 = vpop.f32.mrb[16].mxu1 }
 0x3eb   : > { %v1034_v28 = vpop.f32.mrb[20].mxu0  ;;  %v1086_v30 = vadd.f32 %v1721_v26, %v2223_v37  ;;  %v1077_v38 = vpop.f32.mrb[17].mxu1 }
 0x3ec   : > { %v2303_v39 = vadd.f32 %v1034_v28, %v2223_v37  ;;  %v1036_v42 = vpop.f32.mrb[21].mxu0  ;;  %v1078_v35 = vadd.f32 %v1077_v38, %v2195_v20  ;;  %v1722_v46 = vpop.f32.mrb[18].mxu1 }
 0x3ed   : > { %v1112_v48 = vmax.f32 %v1086_v30, 0.0  ;;  %v2307_v41 = vadd.f32 %v1036_v42, %v2223_v37  ;;  %v1038_v53 = vpop.f32.mrb[22].mxu0  ;;  %v1089_v60 = vadd.f32 %v1722_v46, %v2221_v31  ;;  %v1080_v62 = vpop.f32.mrb[19].mxu1  ;;  %1224 = vrot.lane.b32.xlu1 %v1099_v34, %s1890_s19 }
 0x3ee   : > { %v2680_v63 = vmax.f32 %v2303_v39, 0.0  ;;  %v1098_v2 = vmax.f32 %v1078_v35, 0.0  ;;  %v2315_v3 = vadd.f32 %v1038_v53, %v2221_v31  ;;  %v1040_v20 = vpop.f32.mrb[23].mxu0  ;;  %v1081_v8 = vadd.f32 %v1080_v62, %v2197_v22  ;;  %v1347_v62 = vld [vmem:[%s2670_s5] sm:$0xff] }
 0x3ef   : > { %1141 = vst.msk [vmem:[#allocation3 + $0xa0] sm:$0xff] %vm1126_vm9, %v1112_v48  ;;  %v2679_v37 = vmax.f32 %v2307_v41, 0.0  ;;  %v1119_v9 = vmax.f32 %v1089_v60, 0.0  ;;  %v2321_v14 = vadd.f32 %v1040_v20, %v2221_v31 }
 0x3f0   : > { %1152 = vst.msk [vmem:[#allocation3 + $0xa0] sm:$0xff] %vm1149_vm10, %v1891_v36  ;;  %v2674_v26 = vmax.f32 %v2315_v3, 0.0  ;;  %v1105_v28 = vmax.f32 %v1081_v8, 0.0  ;;  %v1364_v8 = vunpack.c.h.bf16 %v1347_v62 }
 0x3f1   : > { %1127 = vst.msk [vmem:[#allocation3 + $0x30] sm:$0xff] %vm1126_vm9, %v1098_v2  ;;  %1148 = vst.msk [vmem:[#allocation3 + $0xd8] sm:$0xff] %vm1126_vm9, %v1119_v9  ;;  %v2673_v22 = vmax.f32 %v2321_v14, 0.0  ;;  %1228 = vrot.lane.b32.xlu1 %v1101_v57, %s1890_s19  ;;  %v1675_v2 = vld [vmem:[%s2670_s5 + $0x70] sm:$0xff] }
 0x3f2   : > { %1150 = vst.msk [vmem:[#allocation3 + $0x30] sm:$0xff] %vm1149_vm10, %v1891_v36  ;;  %1153 = vst.msk [vmem:[#allocation3 + $0xd8] sm:$0xff] %vm1149_vm10, %v1891_v36  ;;  %v1478_v9 = vunpack.c.h.bf16 %v1675_v2 }
 0x3f3   : > { %1134 = vst.msk [vmem:[#allocation3 + $0x68] sm:$0xff] %vm1126_vm9, %v1105_v28 }
 0x3f4   : > { %1151 = vst.msk [vmem:[#allocation3 + $0x68] sm:$0xff] %vm1149_vm10, %v1891_v36 }
 0x3f5   : > { %1232 = vrot.lane.b32.xlu1 %v1103_v18, %s1890_s19 }
 0x3f7   : > { %v2383_v36 = vld [vmem:[#allocation3 + $0xa0] sm:$0xff] }
 0x3f9   : > { %v2342_v31 = vld [vmem:[#allocation3 + $0x30] sm:$0xff]  ;;  %v2388_v38 = vld [vmem:[#allocation3 + $0xd8] sm:$0xff] }
 0x3fa   : > { %1222 = vrot.lane.b32.xlu0 %v2342_v31, %s1890_s19 }
 0x3fb   : > { %v2346_v30 = vld [vmem:[#allocation3 + $0x68] sm:$0xff] }
 0x3fc   : > { %1236 = vrot.lane.b32.xlu1 %v2346_v30, %s1890_s19 }
 0x3fe   : > { %1226 = vrot.lane.b32.xlu0 %v1100_v25, %s1890_s19 }
 0x400   : > { %1240 = vrot.lane.b32.xlu1 %v2683_v44, %s1890_s19 }
 0x402   : > { %1230 = vrot.lane.b32.xlu0 %v1102_v59, %s1890_s19 }
 0x404   : > { %1244 = vrot.lane.b32.xlu1 %v2681_v11, %s1890_s19 }
 0x406   : > { %1234 = vrot.lane.b32.xlu0 %v2685_v21, %s1890_s19 }
 0x408   : > { %1248 = vrot.lane.b32.xlu1 %v2679_v37, %s1890_s19 }
 0x40a   : > { %1238 = vrot.lane.b32.xlu0 %v2684_v49, %s1890_s19 }
 0x40c   : > { %1252 = vrot.lane.b32.xlu1 %v2678_v56, %s1890_s19  ;;  %v1477_v56 = vunpack.c.l.bf16 %v1675_v2  ;;  %v1350_v2 = vld [vmem:[%s2670_s5 + $0x18] ss:$112 sps:$4 sm:$0xff]  }
 0x40e   : > { %1242 = vrot.lane.b32.xlu0 %v2682_v5, %s1890_s19 }
 0x410   : > { %1256 = vrot.lane.b32.xlu1 %v2676_v16, %s1890_s19 }
 0x412   : > { %1246 = vrot.lane.b32.xlu0 %v2680_v63, %s1890_s19 }
 0x414   : > { %1260 = vrot.lane.b32.xlu1 %v2674_v26, %s1890_s19 }
 0x416   : > { %1250 = vrot.lane.b32.xlu0 %v2383_v36, %s1890_s19 }
 0x418   : > { %1264 = vrot.lane.b32.xlu1 %v2388_v38, %s1890_s19 }
 0x41a   : > { %1254 = vrot.lane.b32.xlu0 %v2677_v58, %s1890_s19  ;;  %v1363_v58 = vunpack.c.l.bf16 %v1347_v62 }
 0x41e   : > { %1258 = vrot.lane.b32.xlu0 %v2675_v19, %s1890_s19  ;;  %v1676_v19 = vld [vmem:[%s2670_s5 + $0x78] sm:$0xff] }
 0x41f   : > { %v1479_v63 = vunpack.c.l.bf16 %v1676_v19  ;;  %v1480_v21 = vunpack.c.h.bf16 %v1676_v19  ;;  %v1367_v19 = vunpack.c.l.bf16 %v1349_v24 }
 0x422   : > { %1262 = vrot.lane.b32.xlu0 %v2673_v22, %s1890_s19  ;;  %v1348_v22 = vld [vmem:[%s2670_s5 + $0x8] sm:$0xff] }
 0x423   : > { %v1365_v37 = vunpack.c.l.bf16 %v1348_v22  ;;  %v1366_v5 = vunpack.c.h.bf16 %v1348_v22 }
 0x449   : > { %v1211_v42 = vpop.permute.xlu0 %1210 }
 0x44a   : > { %v1213_v35 = vpop.permute.xlu1 %1212 }
 0x44b   : > { %v1267_v20 = vsel %vm363_vm1, %v1211_v42, %v1213_v35 }
 0x44c   : > { %v1319_v42 = vmax.f32 %v1092_v4, %v1267_v20 }
 0x44e   : > { %v1391_v44 = vmul.f32 %v1363_v58, %v1319_v42  ;;  %v1505_v49 = vmul.f32 %v1477_v56, %v1319_v42 }
 0x451   : > { %v1215_v46 = vpop.permute.xlu0 %1214 }
 0x452   : > { %v1217_v48 = vpop.permute.xlu1 %1216  ;;  %v1268_v53 = vsel %vm363_vm1, %v1213_v35, %v1215_v46 }
 0x453   : > { %v1320_v28 = vmax.f32 %v1093_v32, %v1268_v53  ;;  %v1269_v16 = vsel %vm363_vm1, %v1215_v46, %v1217_v48 }
 0x454   : > { %v1321_v11 = vmax.f32 %v1094_v47, %v1269_v16 }
 0x455   : > { %v1392_v32 = vmul.f32 %v1364_v8, %v1320_v28  ;;  %v1506_v53 = vmul.f32 %v1478_v9, %v1320_v28  ;;  %v1679_v28 = vld [vmem:[%s2670_s5 + $0x8c] sm:$0xff] }
 0x456   : > { %v1393_v58 = vmul.f32 %v1365_v37, %v1321_v11  ;;  %v1507_v56 = vmul.f32 %v1479_v63, %v1321_v11  ;;  %v1483_v37 = vunpack.c.h.bf16 %v1350_v2 }
 0x457   : > { %v1419_v47 = vadd.f32 %v1392_v32, %v1391_v44  ;;  %v1533_v16 = vadd.f32 %v1506_v53, %v1505_v49  ;;  %v1369_v44 = vunpack.c.l.bf16 %v1350_v2 }
 0x459   : > { %v1420_v20 = vadd.f32 %v1419_v47, %v1393_v58  ;;  %v1534_v8 = vadd.f32 %v1533_v16, %v1507_v56  ;;  %v1484_v16 = vunpack.c.l.bf16 %v1679_v28 }
 0x45a   : > { %v1219_v26 = vpop.permute.xlu0 %1218 }
 0x45b   : > { %v1221_v60 = vpop.permute.xlu1 %1220  ;;  %v1270_v23 = vsel %vm363_vm1, %v1217_v48, %v1219_v26  ;;  %v1677_v48 = vld [vmem:[%s2670_s5 + $0x80] sm:$0xff] }
 0x45c   : > { %v1322_v46 = vmax.f32 %v1095_v50, %v1270_v23  ;;  %v1271_v27 = vsel %vm363_vm1, %v1219_v26, %v1221_v60  ;;  %v1481_v50 = vunpack.c.l.bf16 %v1677_v48  ;;  %v1368_v26 = vunpack.c.h.bf16 %v1349_v24  ;;  %v1352_v24 = vld [vmem:[%s2670_s5 + $0x24] sm:$0xff] }
 0x45d   : > { %v1323_v62 = vmax.f32 %v1096_v10, %v1271_v27  ;;  %v1482_v49 = vunpack.c.h.bf16 %v1677_v48 }
 0x45e   : > { %v1394_v22 = vmul.f32 %v1366_v5, %v1322_v46  ;;  %v1508_v45 = vmul.f32 %v1480_v21, %v1322_v46  ;;  %v1351_v5 = vld [vmem:[%s2670_s5 + $0x1c] sm:$0xff] }
 0x45f   : > { %v1225_v35 = vpop.permute.xlu1 %1224  ;;  %v1395_v0 = vmul.f32 %v1367_v19, %v1323_v62  ;;  %v1509_v10 = vmul.f32 %v1481_v50, %v1323_v62  ;;  %v1370_v53 = vunpack.c.l.bf16 %v1351_v5  ;;  %v1371_v47 = vunpack.c.h.bf16 %v1351_v5 }
 0x460   : > { %v1421_v11 = vadd.f32 %v1420_v20, %v1394_v22  ;;  %v1535_v21 = vadd.f32 %v1534_v8, %v1508_v45  ;;  %v1372_v50 = vunpack.c.l.bf16 %v1352_v24 }
 0x462   : > { %v1422_v58 = vadd.f32 %v1421_v11, %v1395_v0  ;;  %v1536_v56 = vadd.f32 %v1535_v21, %v1509_v10  ;;  %v1487_v11 = vunpack.c.h.bf16 %v1680_v6 }
 0x463   : > { %v2430_v4 = vpop.permute.xlu1 %1228 }
 0x467   : > { %v2441_v9 = vpop.permute.xlu1 %1232 }
 0x46c   : > { %v1223_v63 = vpop.permute.xlu0 %1222 }
 0x46d   : > { %v1272_v42 = vsel %vm363_vm1, %v1221_v60, %v1223_v63  ;;  %v1325_v23 = vmax.f32 %v2342_v31, %v1223_v63 }
 0x46e   : > { %v1324_v32 = vmax.f32 %v1097_v15, %v1272_v42  ;;  %v1237_v46 = vpop.permute.xlu1 %1236  ;;  %v1485_v15 = vunpack.c.h.bf16 %v1679_v28  ;;  %v1681_v42 = vld [vmem:[%s2670_s5 + $0x9c] sm:$0xff] }
 0x46f   : > { %v1397_v48 = vmul.f32 %v1369_v44, %v1325_v23  ;;  %v1511_v27 = vmul.f32 %v1483_v37, %v1325_v23  ;;  %v1486_v37 = vunpack.c.l.bf16 %v1680_v6 }
 0x470   : > { %v1396_v19 = vmul.f32 %v1368_v26, %v1324_v32  ;;  %v1510_v22 = vmul.f32 %v1482_v49, %v1324_v32  ;;  %v1227_v60 = vpop.permute.xlu0 %1226  ;;  %v2469_v26 = vld [vmem:[%s2670_s5 + $0x34] ss:$112 sps:$4 sm:$0xff]  }
 0x471   : > { %v1273_v31 = vsel %vm363_vm1, %v1225_v35, %v1227_v60  ;;  %v1274_v45 = vsel %vm363_vm1, %v1227_v60, %v2430_v4  ;;  %v2476_v35 = vld [vmem:[%s2670_s5 + $0x2c] sm:$0xff]  ;;  %v1424_v49 = vsel %vm1126_vm9, %v1397_v48, 0.0  ;;  %v1538_v29 = vsel %vm1126_vm9, %v1511_v27, 0.0 }
 0x472   : > { %v1423_v62 = vadd.f32 %v1422_v58, %v1396_v19  ;;  %v1537_v2 = vadd.f32 %v1536_v56, %v1510_v22  ;;  %v1326_v20 = vmax.f32 %v1099_v34, %v1273_v31  ;;  %v1327_v8 = vmax.f32 %v1100_v25, %v1274_v45  ;;  %v2471_v44 = vpop.permute.xlu1 %1240 }
 0x473   : > { %v1373_v34 = vunpack.c.h.bf16 %v1352_v24  ;;  %v1376_v10 = vunpack.c.l.bf16 %v2469_v26  ;;  %v1490_v63 = vunpack.c.h.bf16 %v2469_v26  ;;  %v1374_v28 = vunpack.c.l.bf16 %v2476_v35 }
 0x474   : > { %v1425_v33 = vadd.f32 %v1424_v49, %v1423_v62  ;;  %v1539_v25 = vadd.f32 %v1538_v29, %v1537_v2  ;;  %v1398_v5 = vmul.f32 %v1370_v53, %v1326_v20  ;;  %v1231_v21 = vpop.permute.xlu0 %1230  ;;  %v1512_v0 = vmul.f32 %v1484_v16, %v1326_v20  ;;  %v2519_v49 = vld [vmem:[%s2670_s5 + $0xb0] sm:$0xff] }
 0x475   : > { %v1399_v23 = vmul.f32 %v1371_v47, %v1327_v8  ;;  %v1275_v24 = vsel %vm363_vm1, %v2430_v4, %v1231_v21  ;;  %v1276_v53 = vsel %vm363_vm1, %v1231_v21, %v2441_v9  ;;  %v1513_v27 = vmul.f32 %v1485_v15, %v1327_v8  ;;  %v1355_v15 = vld [vmem:[%s2670_s5 + $0x38] sm:$0xff] }
 0x476   : > { %v1426_v32 = vadd.f32 %v1425_v33, %v1398_v5  ;;  %v2490_v48 = vpop.permute.xlu1 %1244  ;;  %v1540_v16 = vadd.f32 %v1539_v25, %v1512_v0  ;;  %v1328_v58 = vmax.f32 %v1101_v57, %v1275_v24  ;;  %v1329_v56 = vmax.f32 %v1102_v59, %v1276_v53 }
 0x477   : > { %v1375_v47 = vunpack.c.h.bf16 %v2476_v35  ;;  %v1488_v22 = vunpack.c.l.bf16 %v1681_v42  ;;  %v1489_v60 = vunpack.c.h.bf16 %v1681_v42  ;;  %v1332_v31 = vmax.f32 %v2346_v30, %v1237_v46 }
 0x478   : > { %v1427_v19 = vadd.f32 %v1426_v32, %v1399_v23  ;;  %v1235_v6 = vpop.permute.xlu0 %1234  ;;  %v1541_v4 = vadd.f32 %v1540_v16, %v1513_v27  ;;  %v1400_v45 = vmul.f32 %v1372_v50, %v1328_v58  ;;  %v1514_v62 = vmul.f32 %v1486_v37, %v1328_v58  ;;  %v2535_v23 = vld [vmem:[%s2670_s5 + $0xb8] sm:$0xff] }
 0x479   : > { %v1401_v57 = vmul.f32 %v1373_v34, %v1329_v56  ;;  %v1515_v59 = vmul.f32 %v1487_v11, %v1329_v56  ;;  %v1277_v30 = vsel %vm363_vm1, %v2441_v9, %v1235_v6  ;;  %v1278_v50 = vsel %vm363_vm1, %v1235_v6, %v1237_v46 }
 0x47a   : > { %v1428_v2 = vadd.f32 %v1427_v19, %v1400_v45  ;;  %v1542_v20 = vadd.f32 %v1541_v4, %v1514_v62  ;;  %v1330_v8 = vmax.f32 %v1103_v18, %v1277_v30  ;;  %v2688_v26 = vmax.f32 %v2290_v17, 0.0  ;;  %v2521_v33 = vpop.permute.xlu1 %1248  ;;  %v2527_v17 = vld [vmem:[%s2670_s5 + $0x48] sm:$0xff] }
 0x47b   : > { %v1377_v29 = vunpack.c.l.bf16 %v1355_v15  ;;  %v1491_v34 = vunpack.c.l.bf16 %v1683_v52  ;;  %v1378_v9 = vunpack.c.h.bf16 %v1355_v15  ;;  %v1379_v46 = vunpack.c.l.bf16 %v2507_v55  ;;  %v1358_v15 = vld [vmem:[%s2670_s5 + $0x50] ss:$112 sps:$4 sm:$0xff]  }
 0x47c   : > { %v1331_v35 = vmax.f32 %v2688_v26, %v1278_v50  ;;  %v1239_v37 = vpop.permute.xlu0 %1238  ;;  %v1429_v25 = vadd.f32 %v1428_v2, %v1401_v57  ;;  %v1543_v5 = vadd.f32 %v1542_v20, %v1515_v59  ;;  %v1402_v12 = vmul.f32 %v1374_v28, %v1330_v8 }
 0x47d   : > { %v1492_v18 = vunpack.c.h.bf16 %v1683_v52  ;;  %v1404_v11 = vmul.f32 %v1376_v10, %v1332_v31  ;;  %v1516_v21 = vmul.f32 %v1488_v22, %v1330_v8  ;;  %v1279_v0 = vsel %vm363_vm1, %v1239_v37, %v2471_v44 }
 0x47e   : > { %v1493_v42 = vunpack.c.l.bf16 %v2519_v49  ;;  %v1518_v32 = vmul.f32 %v1490_v63, %v1332_v31  ;;  %v1403_v28 = vmul.f32 %v1375_v47, %v1331_v35  ;;  %v1430_v24 = vadd.f32 %v1429_v25, %v1402_v12  ;;  %v1253_v62 = vpop.permute.xlu1 %1252 }
 0x47f   : > { %v2689_v53 = vmax.f32 %v2226_v40, 0.0  ;;  %v1517_v16 = vmul.f32 %v1489_v60, %v1331_v35  ;;  %v1544_v58 = vadd.f32 %v1543_v5, %v1516_v21  ;;  %v1380_v56 = vunpack.c.h.bf16 %v2507_v55  ;;  %v1687_v21 = vld [vmem:[%s2670_s5 + $0xc4] sm:$0xff] }
 0x480   : > { %v1243_v10 = vpop.permute.xlu0 %1242  ;;  %v1381_v19 = vunpack.c.l.bf16 %v2527_v17  ;;  %v1431_v22 = vadd.f32 %v1430_v24, %v1403_v28  ;;  %v1494_v4 = vunpack.c.h.bf16 %v2519_v49  ;;  %v1495_v63 = vunpack.c.l.bf16 %v2535_v23 }
 0x481   : > { %v1333_v27 = vmax.f32 %v2689_v53, %v1279_v0  ;;  %v1280_v6 = vsel %vm363_vm1, %v2471_v44, %v1243_v10  ;;  %v1432_v47 = vsel %vm1126_vm9, %v1404_v11, 0.0  ;;  %v1545_v31 = vadd.f32 %v1544_v58, %v1517_v16 }
 0x482   : > { %v1281_v40 = vsel %vm363_vm1, %v1243_v10, %v2490_v48  ;;  %v2690_v60 = vmax.f32 %v2232_v43, 0.0  ;;  %v1546_v44 = vsel %vm1126_vm9, %v1518_v32, 0.0  ;;  %v1433_v52 = vadd.f32 %v1432_v47, %v1431_v22 }
 0x483   : > { %v1405_v55 = vmul.f32 %v1377_v29, %v1333_v27  ;;  %v2691_v57 = vmax.f32 %v2264_v61, 0.0  ;;  %v1547_v30 = vadd.f32 %v1546_v44, %v1545_v31  ;;  %v1519_v50 = vmul.f32 %v1491_v34, %v1333_v27  ;;  %v1359_v34 = vld [vmem:[%s2670_s5 + $0x54] sm:$0xff] }
 0x484   : > { %v1334_v45 = vmax.f32 %v2690_v60, %v1280_v6  ;;  %v1247_v8 = vpop.permute.xlu0 %1246  ;;  %v1383_v35 = vunpack.c.l.bf16 %v1358_v15  ;;  %v1497_v49 = vunpack.c.h.bf16 %v1358_v15  ;;  %v2692_v29 = vmax.f32 %v2270_v1, 0.0 }
 0x485   : > { %v1335_v59 = vmax.f32 %v2691_v57, %v1281_v40  ;;  %v1434_v26 = vadd.f32 %v1433_v52, %v1405_v55  ;;  %v1282_v43 = vsel %vm363_vm1, %v2490_v48, %v1247_v8  ;;  %v1548_v37 = vadd.f32 %v1547_v30, %v1519_v50 }
 0x486   : > { %v1406_v2 = vmul.f32 %v1378_v9, %v1334_v45  ;;  %v1520_v20 = vmul.f32 %v1492_v18, %v1334_v45  ;;  %v1283_v25 = vsel %vm363_vm1, %v1247_v8, %v2521_v33  ;;  %v1336_v5 = vmax.f32 %v2692_v29, %v1282_v43  ;;  %v1361_v43 = vld [vmem:[%s2670_s5 + $0x64] sm:$0xff] }
 0x487   : > { %v1382_v61 = vunpack.c.h.bf16 %v2527_v17  ;;  %v1407_v9 = vmul.f32 %v1379_v46, %v1335_v59  ;;  %v2693_v18 = vmax.f32 %v2303_v39, 0.0  ;;  %v1496_v11 = vunpack.c.h.bf16 %v2535_v23  ;;  %v1257_v17 = vpop.permute.xlu1 %1256 }
 0x488   : > { %v1435_v12 = vadd.f32 %v1434_v26, %v1406_v2  ;;  %v1521_v0 = vmul.f32 %v1493_v42, %v1335_v59  ;;  %v1549_v1 = vadd.f32 %v1548_v37, %v1520_v20  ;;  %v1408_v32 = vmul.f32 %v1380_v56, %v1336_v5  ;;  %v1251_v24 = vpop.permute.xlu0 %1250 }
 0x489   : > { %v1337_v48 = vmax.f32 %v2693_v18, %v1283_v25  ;;  %v1522_v28 = vmul.f32 %v1494_v4, %v1336_v5  ;;  %v1284_v46 = vsel %vm363_vm1, %v2521_v33, %v1251_v24  ;;  %v1384_v27 = vunpack.c.l.bf16 %v1359_v34  ;;  %v1360_v4 = vld [vmem:[%s2670_s5 + $0x5c] sm:$0xff] }
 0x48a   : > { %v1436_v53 = vadd.f32 %v1435_v12, %v1407_v9  ;;  %v1385_v16 = vunpack.c.h.bf16 %v1359_v34  ;;  %v1550_v39 = vadd.f32 %v1549_v1, %v1521_v0  ;;  %v2694_v58 = vmax.f32 %v2307_v41, 0.0  ;;  %v1688_v41 = vld [vmem:[%s2670_s5 + $0xcc] sm:$0xff] }
 0x48b   : > { %v1339_v10 = vmax.f32 %v2383_v36, %v1251_v24  ;;  %v1498_v22 = vunpack.c.l.bf16 %v1687_v21  ;;  %v1409_v6 = vmul.f32 %v1381_v19, %v1337_v48  ;;  %v1523_v47 = vmul.f32 %v1495_v63, %v1337_v48  ;;  %v1261_v52 = vpop.permute.xlu1 %1260 }
 0x48c   : > { %v1338_v23 = vmax.f32 %v2694_v58, %v1284_v46  ;;  %v1437_v42 = vadd.f32 %v1436_v53, %v1408_v32  ;;  %v1499_v56 = vunpack.c.h.bf16 %v1687_v21  ;;  %v1551_v31 = vadd.f32 %v1550_v39, %v1522_v28  ;;  %v1255_v45 = vpop.permute.xlu0 %1254  ;;  %v1362_v28 = vld [vmem:[%s2670_s5 + $0x6c] ss:$112 sps:$4 sm:$0xff]  }
 0x48d   : > { %v1411_v33 = vmul.f32 %v1383_v35, %v1339_v10  ;;  %v1525_v36 = vmul.f32 %v1497_v49, %v1339_v10  ;;  %v1285_v19 = vsel %vm363_vm1, %v1253_v62, %v1255_v45  ;;  %v1286_v63 = vsel %vm363_vm1, %v1255_v45, %v1257_v17 }
 0x48e   : > { %v1410_v40 = vmul.f32 %v1382_v61, %v1338_v23  ;;  %v1524_v60 = vmul.f32 %v1496_v11, %v1338_v23  ;;  %v1438_v15 = vadd.f32 %v1437_v42, %v1409_v6  ;;  %v1552_v44 = vadd.f32 %v1551_v31, %v1523_v47 }
 0x48f   : > { %v2695_v55 = vmax.f32 %v2240_v51, 0.0  ;;  %v1386_v59 = vunpack.c.l.bf16 %v1360_v4  ;;  %v1387_v30 = vunpack.c.h.bf16 %v1360_v4  ;;  %v2696_v2 = vmax.f32 %v2248_v54, 0.0  ;;  %v1689_v51 = vld [vmem:[%s2670_s5 + $0xd4] sm:$0xff]  ;;  %v1265_v18 = vpop.permute.xlu1 %1264 }
 0x490   : > { %v1439_v50 = vadd.f32 %v1438_v15, %v1410_v40  ;;  %v1500_v8 = vunpack.c.l.bf16 %v1688_v41  ;;  %v1501_v26 = vunpack.c.h.bf16 %v1688_v41  ;;  %v1440_v62 = vsel %vm1126_vm9, %v1411_v33, 0.0  ;;  %v1259_v25 = vpop.permute.xlu0 %1258 }
 0x491   : > { %v1340_v57 = vmax.f32 %v2695_v55, %v1285_v19  ;;  %v1341_v20 = vmax.f32 %v2696_v2, %v1286_v63  ;;  %v1553_v35 = vadd.f32 %v1552_v44, %v1524_v60  ;;  %v1554_v54 = vsel %vm1126_vm9, %v1525_v36, 0.0 }
 0x492   : > { %v1441_v29 = vadd.f32 %v1440_v62, %v1439_v50  ;;  %v1287_v5 = vsel %vm363_vm1, %v1257_v17, %v1259_v25  ;;  %v1288_v61 = vsel %vm363_vm1, %v1259_v25, %v1261_v52  ;;  %v2697_v9 = vmax.f32 %v2277_v7, 0.0 }
 0x493   : > { %v1412_v49 = vmul.f32 %v1384_v27, %v1340_v57  ;;  %v1526_v37 = vmul.f32 %v1498_v22, %v1340_v57  ;;  %v1555_v34 = vadd.f32 %v1554_v54, %v1553_v35  ;;  %v1388_v48 = vunpack.c.l.bf16 %v1361_v43 }
 0x494   : > { %v1342_v12 = vmax.f32 %v2697_v9, %v1287_v5  ;;  %v1389_v11 = vunpack.c.h.bf16 %v1361_v43  ;;  %v1413_v21 = vmul.f32 %v1385_v16, %v1341_v20  ;;  %v2698_v1 = vmax.f32 %v2285_v13, 0.0  ;;  %v1263_v39 = vpop.permute.xlu0 %1262 }
 0x495   : > { %v1442_v0 = vadd.f32 %v1441_v29, %v1412_v49  ;;  %v1502_v24 = vunpack.c.l.bf16 %v1689_v51  ;;  %v1527_v17 = vmul.f32 %v1499_v56, %v1341_v20  ;;  %v1556_v53 = vadd.f32 %v1555_v34, %v1526_v37  ;;  %v1576_v34 = vld [vmem:[%s2671_s6] sm:$0x1] }
 0x496   : > { %v1343_v32 = vmax.f32 %v2698_v1, %v1288_v61  ;;  %v1414_v46 = vmul.f32 %v1386_v59, %v1342_v12  ;;  %v1528_v27 = vmul.f32 %v1500_v8, %v1342_v12  ;;  %v1503_v58 = vunpack.c.h.bf16 %v1689_v51 }
 0x497   : > { %v1443_v7 = vadd.f32 %v1442_v0, %v1413_v21  ;;  %v1289_v23 = vsel %vm363_vm1, %v1261_v52, %v1263_v39  ;;  %v1290_v16 = vsel %vm363_vm1, %v1263_v39, %v1265_v18  ;;  %v1557_v10 = vadd.f32 %v1556_v53, %v1527_v17 }
 0x498   : > { %v1390_v22 = vunpack.c.l.bf16 %v1362_v28  ;;  %v1346_v13 = vmax.f32 %v2388_v38, %v1265_v18  ;;  %v2699_v6 = vmax.f32 %v2315_v3, 0.0  ;;  %v1415_v47 = vmul.f32 %v1387_v30, %v1343_v32 }
 0x499   : > { %v1444_v4 = vadd.f32 %v1443_v7, %v1414_v46  ;;  %v1504_v56 = vunpack.c.h.bf16 %v1362_v28  ;;  %v2700_v31 = vmax.f32 %v2321_v14, 0.0  ;;  %v1529_v33 = vmul.f32 %v1501_v26, %v1343_v32 }
 0x49a   : > { %v1344_v42 = vmax.f32 %v2699_v6, %v1289_v23  ;;  %v1558_v60 = vadd.f32 %v1557_v10, %v1528_v27  ;;  %v1418_v19 = vmul.f32 %v1390_v22, %v1346_v13 }
 0x49b   : > { %v1345_v40 = vmax.f32 %v2700_v31, %v1290_v16  ;;  %v1445_v15 = vadd.f32 %v1444_v4, %v1415_v47  ;;  %v1532_v63 = vmul.f32 %v1504_v56, %v1346_v13 }
 0x49c   : > { %v1416_v45 = vmul.f32 %v1388_v48, %v1344_v42  ;;  %v1530_v41 = vmul.f32 %v1502_v24, %v1344_v42  ;;  %v1559_v36 = vadd.f32 %v1558_v60, %v1529_v33  ;;  %v1448_v59 = vsel %vm1126_vm9, %v1418_v19, 0.0 }
 0x49d   : > { %v1417_v44 = vmul.f32 %v1389_v11, %v1345_v40  ;;  %v1531_v38 = vmul.f32 %v1503_v58, %v1345_v40  ;;  %v1562_v30 = vsel %vm1126_vm9, %v1532_v63, 0.0 }
 0x49e   : > { %v1446_v52 = vadd.f32 %v1445_v15, %v1416_v45  ;;  %v1560_v55 = vadd.f32 %v1559_v36, %v1530_v41 }
 0x4a0   : > { %v1447_v3 = vadd.f32 %v1446_v52, %v1417_v44  ;;  %v1561_v57 = vadd.f32 %v1560_v55, %v1531_v38 }
 0x4a2   : > { %v1449_v14 = vadd.f32 %v1448_v59, %v1447_v3  ;;  %v1563_v50 = vadd.f32 %v1562_v30, %v1561_v57 }
 0x4a4   : > { %1450 = vadd.xlane.f32.xlu0 %v1449_v14  ;;  %1564 = vadd.xlane.f32.xlu1 %v1563_v50 }
 0x531   : > { %v1451_v2 = vpop.xlane.xlu0 %1450  ;;  %v1565_v20 = vpop.xlane.xlu1 %1564 }
 0x532   : > { %v1452_v8 = vrot.slane %v1451_v2, 4  ;;  %v1566_v26 = vrot.slane %v1565_v20, 4 }
 0x534   : > { %v1453_v43 = vadd.f32 %v1452_v8, %v1451_v2  ;;  %v1567_v62 = vadd.f32 %v1566_v26, %v1565_v20 }
 0x536   : > { %v1454_v35 = vrot.slane %v1453_v43, 2  ;;  %v1568_v49 = vrot.slane %v1567_v62, 2 }
 0x538   : > { %v1455_v37 = vadd.f32 %v1454_v35, %v1453_v43  ;;  %v1569_v25 = vadd.f32 %v1568_v49, %v1567_v62 }
 0x53a   : > { %v1456_v51 = vrot.slane %v1455_v37, 1  ;;  %v1570_v29 = vrot.slane %v1569_v25, 1 }
 0x53c   : > { %v1457_v54 = vadd.f32 %v1456_v51, %v1455_v37  ;;  %v1571_v5 = vadd.f32 %v1570_v29, %v1569_v25 }
 0x53e   : > { %1724 = vpush %v1457_v54 }
 0x53f   : > { %1726 = vpush %v1571_v5 }
 0x56f   : > { %s1725_s14 = spop %1724 }
 0x570   : > { %v1459_v61 = vstv %s1725_s14  ;;  %s1727_s16 = spop %1726  ;;  %s1830_s14 = scalar_lea.vmem %s1829_s9, 32 }
 0x571   : > { %v1573_v9 = vstv %s1727_s16  ;;  %p1832_p1 = scmp.lt.s32.totalorder %s1830_s14, %s1824_s29 }
 0x572   : > { %v1575_v12 = vsel %vm1574_vm11, %v1459_v61, %v1573_v9 }
 0x573   : > { %v1577_v18 = vadd.f32 %v1576_v34, %v1575_v12  ;;  %p1833_p2 = por %p1832_p1, %p1831_p0 }
 0x575   : > { %1579 = vst.msk [vmem:[%s270_s18] sm:$0x1] %vm1578_vm12, %v1577_v18  ;;  %p1834_p3 = pnand %p1833_p2, %p1827_p13 }
 0x577   : > { %1837 = shalt.err (!%p1834_p3)
}
 0x578   : > { %s1838_s13 = scalar_lea.hbm %s2623_s23, 16  ;;  %s1842_s19 = scalar_lea.hbm %s2672_s7, 32 }
 0x579   : > { %p1839_p4 = scmp.ne.s32.totalorder %s2623_s23, %s1838_s13  ;;  %p1843_p9 = scmp.lt.u32.totalorder %s2623_s23, %s2672_s7 }
 0x57a   : > { %p1844_p10 = scmp.lt.u32.totalorder %s1842_s19, %s1838_s13  ;;  %p1846_p12 = scmp.lt.u32.totalorder %s1838_s13, %s2623_s23 }
 0x57b   : > { %p1840_p7 = pnand %p1839_p4, %p1974_p5 }
 0x57c   : > { %p1845_p11 = por %p1844_p10, %p1843_p9 }
 0x57d   : > { %p1841_p8 = pneg %p1840_p7 }
 0x57e   : > { %p1847_p13 = por %p1846_p12, %p1845_p11 }
 0x580   : > { %p1848_p0 = pnand %p1847_p13, %p1841_p8 }
 0x582   : > { %1851 = shalt.err (!%p1848_p0)
}
 0x583   : > { %1728 = dma.vmem_to_hbm [thread:$0]  (%p1974_p5), %s2625_s20, 16, %s2623_s23, %s1581_s28  }
 0x584 PF: > { %p1734_p1 = scmp.ge.s32.totalorder %s1886_s27, 2  ;;  %s1605_s21 = sand.u32 1, %s1874_s24  }
 0x585   : > { %s1606_s22 = scalar_lea.sflag [#allocation5], %s1605_s21 }
 0x586   : > { %p1731_p2 = pnand %p1734_p1, %p1978_p6 }
 0x588   : > { %1869 = dma.done.wait (!%p1731_p2), %s1606_s22, 16  }
 0x589   : > { %1871 = vsyncadd (!%p1731_p2), %s1606_s22, 4294967280  ;;  %p17_p3 = scmp.ge.s32.totalorder %s1961_s30, 4   ;;  %s2701_s24 = smov %s1878_s25 }
 0x58a   : > { %s2702_s25 = smov %s1882_s26  ;;  %s2703_s26 = smov %s1972_s10 }
 0x58b   : > { %s2704_s27 = smov %s1961_s30  ;;  %19 = sbr.rel (!%p17_p3) target bundleno = 3 (0x3), region = 84 }
 0x592   :  { %1610 = vsyncpa [#allocation5], 1 }
 0x593   :  { %1612 = vsyncpa [#allocation5 + $0x1], 1 }

</bundles_post_ra>
